<compile_context>
chip_gen: v7x
topology: tpu7x:2x2x1
jax: 0.10.0
libtpu: 0.0.40
codegen_flags: <defaults>
</compile_context>

<pallas_src>
import jax
import jax.numpy as jnp
from jax import lax
from jax.experimental import pallas as pl
from jax.experimental.pallas import tpu as pltpu


def _round_up(x, m):
    return (x + m - 1) // m * m


def _cbow_kernel(ctx_ref,     # (Bp, C) int32, SMEM (scalar prefetch)
                 table_hbm,   # (V, Ep) f32, HBM (memory_space=pl.ANY)
                 w_ref,       # (TV, Ep) f32 VMEM tile (PyTorch (V, E) row layout)
                 b_ref,       # (1, TV)  f32 VMEM tile
                 out_ref,     # (TB, TV) f32 VMEM tile
                 emb_buf,     # (C*TB, Ep) f32 VMEM scratch: gathered rows
                 agg_ref,     # (TB, Ep)   f32 VMEM scratch: mean embedding (persists over j)
                 sems):       # (C*TB,) DMA semaphores
    i = pl.program_id(0)      # batch tile index  ("parallel")
    j = pl.program_id(1)      # vocab tile index  ("arbitrary")
    TB, _ = agg_ref.shape
    C = emb_buf.shape[0] // TB

    # Gather + mean only once per batch tile (first vocab tile); the result is
    # kept in `agg_ref` scratch for all subsequent vocab tiles of this batch tile.
    @pl.when(j == 0)
    def _gather_and_mean():
        # Issue all row-gather DMAs (HBM table row -> VMEM), then wait.
        for b in range(TB):
            for c in range(C):
                tok = ctx_ref[i * TB + b, c]
                slot = c * TB + b
                pltpu.make_async_copy(
                    table_hbm.at[pl.ds(tok, 1)],
                    emb_buf.at[pl.ds(slot, 1)],
                    sems.at[slot],
                ).start()
        for b in range(TB):
            for c in range(C):
                slot = c * TB + b
                pltpu.make_async_copy(
                    table_hbm.at[pl.ds(0, 1)],      # shape-only; dst/sem identify the DMA
                    emb_buf.at[pl.ds(slot, 1)],
                    sems.at[slot],
                ).wait()
        # Mean over the context window (C is small & static -> unrolled VPU adds).
        acc = emb_buf[pl.ds(0, TB), :]
        for c in range(1, C):
            acc = acc + emb_buf[pl.ds(c * TB, TB), :]
        agg_ref[...] = acc * (1.0 / C)

    # Linear layer for this vocab tile: agg @ W_tile^T + bias_tile  (MXU).
    # Contract on E directly (no host-side transpose of the weight).
    logits = lax.dot_general(
        agg_ref[...], w_ref[...],
        dimension_numbers=(((1,), (1,)), ((), ())),
        preferred_element_type=jnp.float32,
    )
    out_ref[...] = (logits + b_ref[...]).astype(out_ref.dtype)


def cbow_forward(context, table, weight, bias, *, tile_v=128, tile_b=8):
    """context: (B, C) int ids; table: (V, E); weight: (V, E) (PyTorch Linear layout); bias: (V,)."""
    B, C = context.shape
    V, E = table.shape

    Ep = _round_up(E, 128)        # lane-dense embedding dim for agg / MXU contraction
    Vp = _round_up(V, tile_v)     # lane-dense, tileable vocab axis (unmasked stores)
    Bp = _round_up(B, tile_b)     # sublane-aligned batch (f32 -> multiples of 8)

    ctx_p = jnp.zeros((Bp, C), jnp.int32).at[:B, :].set(context.astype(jnp.int32))
    tab_p = jnp.zeros((V, Ep), jnp.float32).at[:, :E].set(table.astype(jnp.float32))
    w_p = jnp.zeros((Vp, Ep), jnp.float32).at[:V, :E].set(weight.astype(jnp.float32))
    b_p = jnp.zeros((1, Vp), jnp.float32).at[0, :V].set(bias.astype(jnp.float32))

    nb = Bp // tile_b
    nv = Vp // tile_v

    cost = pl.CostEstimate(
        flops=2 * Bp * Ep * Vp + Bp * C * Ep,
        transcendentals=0,
        bytes_accessed=(ctx_p.size * 4 + Bp * C * Ep * 4
                        + w_p.size * 4 + b_p.size * 4 + Bp * Vp * 4),
    )

    out_p = pl.pallas_call(
        _cbow_kernel,
        out_shape=jax.ShapeDtypeStruct((Bp, Vp), jnp.float32),
        grid_spec=pltpu.PrefetchScalarGridSpec(
            num_scalar_prefetch=1,                # context ids -> SMEM, read in-kernel
            grid=(nb, nv),
            in_specs=[
                pl.BlockSpec(memory_space=pl.ANY),                      # table stays in HBM
                pl.BlockSpec((tile_v, Ep), lambda i, j, ctx: (j, 0)),   # weight tile
                pl.BlockSpec((1, tile_v), lambda i, j, ctx: (0, j)),    # bias tile
            ],
            out_specs=pl.BlockSpec((tile_b, tile_v), lambda i, j, ctx: (i, j)),
            scratch_shapes=[
                pltpu.VMEM((C * tile_b, Ep), jnp.float32),   # gathered embedding rows
                pltpu.VMEM((tile_b, Ep), jnp.float32),       # per-batch-tile mean (agg)
                pltpu.SemaphoreType.DMA((C * tile_b,)),      # one sem per gathered row
            ],
        ),
        compiler_params=pltpu.CompilerParams(
            dimension_semantics=("parallel", "arbitrary"),   # batch tiles across cores
        ),
        cost_estimate=cost,
    )(ctx_p, tab_p, w_p, b_p)

    return out_p[:B, :V]


def cbow_reference(context, table, weight, bias):
    embedded = table[context]                    # (B, C, E)
    aggregated = jnp.mean(embedded, axis=1)      # (B, E)
    return aggregated @ weight.T + bias          # (B, V)


if __name__ == "__main__":
    VOCAB_SIZE = 64
    EMBED_DIM = 32
    BATCH = 8
    CONTEXT = 4  # context window size (e.g. 2 words on each side)

    key = jax.random.PRNGKey(0)
    k_emb, k_w, k_b, k_ctx = jax.random.split(key, 4)

    # Deterministic synthetic parameters (shapes from CBOW.__init__).
    table = jax.random.normal(k_emb, (VOCAB_SIZE, EMBED_DIM), dtype=jnp.float32)
    bound = 1.0 / (EMBED_DIM ** 0.5)
    weight = jax.random.uniform(k_w, (VOCAB_SIZE, EMBED_DIM),
                                minval=-bound, maxval=bound, dtype=jnp.float32)
    bias = jax.random.uniform(k_b, (VOCAB_SIZE,),
                              minval=-bound, maxval=bound, dtype=jnp.float32)

    # NOTE: token ids must lie in [0, VOCAB_SIZE) — same precondition as nn.Embedding.
    context = jax.random.randint(k_ctx, (BATCH, CONTEXT), 0, VOCAB_SIZE, dtype=jnp.int32)

    out = jax.jit(cbow_forward)(context, table, weight, bias)
    out = jax.block_until_ready(out)

    ref = cbow_reference(context, table, weight, bias)
    assert out.shape == (BATCH, VOCAB_SIZE)
    assert jnp.allclose(out, ref, atol=1e-4, rtol=1e-4), "mismatch vs reference"

    print("KERNEL_OK")
</pallas_src>

<mosaic_0001>
module attributes {stable_mosaic.version = 11 : i64} {
  func.func @_cbow_kernel(%arg0: i32, %arg1: i32, %arg2: memref<8x4xi32, #tpu.memory_space<smem>>, %arg3: memref<64x128xf32, #tpu.memory_space<any>>, %arg4: memref<128x128xf32, #tpu.memory_space<vmem>>, %arg5: memref<1x128xf32, #tpu.memory_space<vmem>>, %arg6: memref<8x128xf32, #tpu.memory_space<vmem>>, %arg7: memref<32x128xf32, #tpu.memory_space<vmem>>, %arg8: memref<8x128xf32, #tpu.memory_space<vmem>>, %arg9: memref<32x!tpu.dma_semaphore, #tpu.memory_space<semaphore_mem>>) attributes {dimension_semantics = [#tpu.dimension_semantics<parallel>, #tpu.dimension_semantics<arbitrary>], iteration_bounds = array<i64: 1, 1>, scalar_prefetch = 1 : i64, scratch_operands = 3 : i64, tpu.core_type = #tpu.core_type<tc>, window_params = [{}, {transform_indices = @transform_1, window_bounds = array<i64: 128, 128>}, {transform_indices = @transform_2, window_bounds = array<i64: 1, 128>}, {transform_indices = @transform_3, window_bounds = array<i64: 8, 128>}]} {
    %c0_i32 = arith.constant 0 : i32
    %0 = arith.cmpi eq, %arg1, %c0_i32 : i32
    %1 = arith.extui %0 : i1 to i32
    %c0_i32_0 = arith.constant 0 : i32
    %2 = arith.cmpi ne, %1, %c0_i32_0 : i32
    scf.if %2 {
      %c8_i32 = arith.constant 8 : i32
      %10 = arith.muli %arg0, %c8_i32 : i32
      %c0_i32_8 = arith.constant 0 : i32
      %11 = arith.addi %10, %c0_i32_8 : i32
      %12 = arith.index_cast %11 : i32 to index
      %c0_9 = arith.constant 0 : index
      %13 = memref.load %arg2[%12, %c0_9] : memref<8x4xi32, #tpu.memory_space<smem>>
      %c0_i32_10 = arith.constant 0 : i32
      %c0_i32_11 = arith.constant 0 : i32
      %14 = tpu.memref_slice %arg3[%13, %c0_i32_11] : memref<64x128xf32, #tpu.memory_space<any>> -> memref<1x128xf32, #tpu.memory_space<any>>
      %c0_i32_12 = arith.constant 0 : i32
      %c0_i32_13 = arith.constant 0 : i32
      %15 = tpu.memref_slice %arg7[%c0_i32_12, %c0_i32_13] : memref<32x128xf32, #tpu.memory_space<vmem>> -> memref<1x128xf32, #tpu.memory_space<vmem>>
      %16 = tpu.memref_slice %arg9[%c0_i32_10] : memref<32x!tpu.dma_semaphore, #tpu.memory_space<semaphore_mem>> -> memref<1x!tpu.dma_semaphore, #tpu.memory_space<semaphore_mem>>
      %17 = tpu.memref_squeeze %16 : memref<1x!tpu.dma_semaphore, #tpu.memory_space<semaphore_mem>> -> memref<!tpu.dma_semaphore, #tpu.memory_space<semaphore_mem>>
      tpu.enqueue_dma source(%14 : memref<1x128xf32, #tpu.memory_space<any>>) target(%15 : memref<1x128xf32, #tpu.memory_space<vmem>>) target_semaphore(%17 : memref<!tpu.dma_semaphore, #tpu.memory_space<semaphore_mem>>)
      %c8_i32_14 = arith.constant 8 : i32
      %18 = arith.muli %arg0, %c8_i32_14 : i32
      %c0_i32_15 = arith.constant 0 : i32
      %19 = arith.addi %18, %c0_i32_15 : i32
      %20 = arith.index_cast %19 : i32 to index
      %c1 = arith.constant 1 : index
      %21 = memref.load %arg2[%20, %c1] : memref<8x4xi32, #tpu.memory_space<smem>>
      %c8_i32_16 = arith.constant 8 : i32
      %c0_i32_17 = arith.constant 0 : i32
      %22 = tpu.memref_slice %arg3[%21, %c0_i32_17] : memref<64x128xf32, #tpu.memory_space<any>> -> memref<1x128xf32, #tpu.memory_space<any>>
      %c8_i32_18 = arith.constant 8 : i32
      %c0_i32_19 = arith.constant 0 : i32
      %23 = tpu.memref_slice %arg7[%c8_i32_18, %c0_i32_19] : memref<32x128xf32, #tpu.memory_space<vmem>> -> memref<1x128xf32, #tpu.memory_space<vmem>>
      %24 = tpu.memref_slice %arg9[%c8_i32_16] : memref<32x!tpu.dma_semaphore, #tpu.memory_space<semaphore_mem>> -> memref<1x!tpu.dma_semaphore, #tpu.memory_space<semaphore_mem>>
      %25 = tpu.memref_squeeze %24 : memref<1x!tpu.dma_semaphore, #tpu.memory_space<semaphore_mem>> -> memref<!tpu.dma_semaphore, #tpu.memory_space<semaphore_mem>>
      tpu.enqueue_dma source(%22 : memref<1x128xf32, #tpu.memory_space<any>>) target(%23 : memref<1x128xf32, #tpu.memory_space<vmem>>) target_semaphore(%25 : memref<!tpu.dma_semaphore, #tpu.memory_space<semaphore_mem>>)
      %c8_i32_20 = arith.constant 8 : i32
      %26 = arith.muli %arg0, %c8_i32_20 : i32
      %c0_i32_21 = arith.constant 0 : i32
      %27 = arith.addi %26, %c0_i32_21 : i32
      %28 = arith.index_cast %27 : i32 to index
      %c2 = arith.constant 2 : index
      %29 = memref.load %arg2[%28, %c2] : memref<8x4xi32, #tpu.memory_space<smem>>
      %c16_i32 = arith.constant 16 : i32
      %c0_i32_22 = arith.constant 0 : i32
      %30 = tpu.memref_slice %arg3[%29, %c0_i32_22] : memref<64x128xf32, #tpu.memory_space<any>> -> memref<1x128xf32, #tpu.memory_space<any>>
      %c16_i32_23 = arith.constant 16 : i32
      %c0_i32_24 = arith.constant 0 : i32
      %31 = tpu.memref_slice %arg7[%c16_i32_23, %c0_i32_24] : memref<32x128xf32, #tpu.memory_space<vmem>> -> memref<1x128xf32, #tpu.memory_space<vmem>>
      %32 = tpu.memref_slice %arg9[%c16_i32] : memref<32x!tpu.dma_semaphore, #tpu.memory_space<semaphore_mem>> -> memref<1x!tpu.dma_semaphore, #tpu.memory_space<semaphore_mem>>
      %33 = tpu.memref_squeeze %32 : memref<1x!tpu.dma_semaphore, #tpu.memory_space<semaphore_mem>> -> memref<!tpu.dma_semaphore, #tpu.memory_space<semaphore_mem>>
      tpu.enqueue_dma source(%30 : memref<1x128xf32, #tpu.memory_space<any>>) target(%31 : memref<1x128xf32, #tpu.memory_space<vmem>>) target_semaphore(%33 : memref<!tpu.dma_semaphore, #tpu.memory_space<semaphore_mem>>)
      %c8_i32_25 = arith.constant 8 : i32
      %34 = arith.muli %arg0, %c8_i32_25 : i32
      %c0_i32_26 = arith.constant 0 : i32
      %35 = arith.addi %34, %c0_i32_26 : i32
      %36 = arith.index_cast %35 : i32 to index
      %c3 = arith.constant 3 : index
      %37 = memref.load %arg2[%36, %c3] : memref<8x4xi32, #tpu.memory_space<smem>>
      %c24_i32 = arith.constant 24 : i32
      %c0_i32_27 = arith.constant 0 : i32
      %38 = tpu.memref_slice %arg3[%37, %c0_i32_27] : memref<64x128xf32, #tpu.memory_space<any>> -> memref<1x128xf32, #tpu.memory_space<any>>
      %c24_i32_28 = arith.constant 24 : i32
      %c0_i32_29 = arith.constant 0 : i32
      %39 = tpu.memref_slice %arg7[%c24_i32_28, %c0_i32_29] : memref<32x128xf32, #tpu.memory_space<vmem>> -> memref<1x128xf32, #tpu.memory_space<vmem>>
      %40 = tpu.memref_slice %arg9[%c24_i32] : memref<32x!tpu.dma_semaphore, #tpu.memory_space<semaphore_mem>> -> memref<1x!tpu.dma_semaphore, #tpu.memory_space<semaphore_mem>>
      %41 = tpu.memref_squeeze %40 : memref<1x!tpu.dma_semaphore, #tpu.memory_space<semaphore_mem>> -> memref<!tpu.dma_semaphore, #tpu.memory_space<semaphore_mem>>
      tpu.enqueue_dma source(%38 : memref<1x128xf32, #tpu.memory_space<any>>) target(%39 : memref<1x128xf32, #tpu.memory_space<vmem>>) target_semaphore(%41 : memref<!tpu.dma_semaphore, #tpu.memory_space<semaphore_mem>>)
      %c8_i32_30 = arith.constant 8 : i32
      %42 = arith.muli %arg0, %c8_i32_30 : i32
      %c1_i32 = arith.constant 1 : i32
      %43 = arith.addi %42, %c1_i32 : i32
      %44 = arith.index_cast %43 : i32 to index
      %c0_31 = arith.constant 0 : index
      %45 = memref.load %arg2[%44, %c0_31] : memref<8x4xi32, #tpu.memory_space<smem>>
      %c1_i32_32 = arith.constant 1 : i32
      %c0_i32_33 = arith.constant 0 : i32
      %46 = tpu.memref_slice %arg3[%45, %c0_i32_33] : memref<64x128xf32, #tpu.memory_space<any>> -> memref<1x128xf32, #tpu.memory_space<any>>
      %c1_i32_34 = arith.constant 1 : i32
      %c0_i32_35 = arith.constant 0 : i32
      %47 = tpu.memref_slice %arg7[%c1_i32_34, %c0_i32_35] : memref<32x128xf32, #tpu.memory_space<vmem>> -> memref<1x128xf32, #tpu.memory_space<vmem>>
      %48 = tpu.memref_slice %arg9[%c1_i32_32] : memref<32x!tpu.dma_semaphore, #tpu.memory_space<semaphore_mem>> -> memref<1x!tpu.dma_semaphore, #tpu.memory_space<semaphore_mem>>
      %49 = tpu.memref_squeeze %48 : memref<1x!tpu.dma_semaphore, #tpu.memory_space<semaphore_mem>> -> memref<!tpu.dma_semaphore, #tpu.memory_space<semaphore_mem>>
      tpu.enqueue_dma source(%46 : memref<1x128xf32, #tpu.memory_space<any>>) target(%47 : memref<1x128xf32, #tpu.memory_space<vmem>>) target_semaphore(%49 : memref<!tpu.dma_semaphore, #tpu.memory_space<semaphore_mem>>)
      %c8_i32_36 = arith.constant 8 : i32
      %50 = arith.muli %arg0, %c8_i32_36 : i32
      %c1_i32_37 = arith.constant 1 : i32
      %51 = arith.addi %50, %c1_i32_37 : i32
      %52 = arith.index_cast %51 : i32 to index
      %c1_38 = arith.constant 1 : index
      %53 = memref.load %arg2[%52, %c1_38] : memref<8x4xi32, #tpu.memory_space<smem>>
      %c9_i32 = arith.constant 9 : i32
      %c0_i32_39 = arith.constant 0 : i32
      %54 = tpu.memref_slice %arg3[%53, %c0_i32_39] : memref<64x128xf32, #tpu.memory_space<any>> -> memref<1x128xf32, #tpu.memory_space<any>>
      %c9_i32_40 = arith.constant 9 : i32
      %c0_i32_41 = arith.constant 0 : i32
      %55 = tpu.memref_slice %arg7[%c9_i32_40, %c0_i32_41] : memref<32x128xf32, #tpu.memory_space<vmem>> -> memref<1x128xf32, #tpu.memory_space<vmem>>
      %56 = tpu.memref_slice %arg9[%c9_i32] : memref<32x!tpu.dma_semaphore, #tpu.memory_space<semaphore_mem>> -> memref<1x!tpu.dma_semaphore, #tpu.memory_space<semaphore_mem>>
      %57 = tpu.memref_squeeze %56 : memref<1x!tpu.dma_semaphore, #tpu.memory_space<semaphore_mem>> -> memref<!tpu.dma_semaphore, #tpu.memory_space<semaphore_mem>>
      tpu.enqueue_dma source(%54 : memref<1x128xf32, #tpu.memory_space<any>>) target(%55 : memref<1x128xf32, #tpu.memory_space<vmem>>) target_semaphore(%57 : memref<!tpu.dma_semaphore, #tpu.memory_space<semaphore_mem>>)
      %c8_i32_42 = arith.constant 8 : i32
      %58 = arith.muli %arg0, %c8_i32_42 : i32
      %c1_i32_43 = arith.constant 1 : i32
      %59 = arith.addi %58, %c1_i32_43 : i32
      %60 = arith.index_cast %59 : i32 to index
      %c2_44 = arith.constant 2 : index
      %61 = memref.load %arg2[%60, %c2_44] : memref<8x4xi32, #tpu.memory_space<smem>>
      %c17_i32 = arith.constant 17 : i32
      %c0_i32_45 = arith.constant 0 : i32
      %62 = tpu.memref_slice %arg3[%61, %c0_i32_45] : memref<64x128xf32, #tpu.memory_space<any>> -> memref<1x128xf32, #tpu.memory_space<any>>
      %c17_i32_46 = arith.constant 17 : i32
      %c0_i32_47 = arith.constant 0 : i32
      %63 = tpu.memref_slice %arg7[%c17_i32_46, %c0_i32_47] : memref<32x128xf32, #tpu.memory_space<vmem>> -> memref<1x128xf32, #tpu.memory_space<vmem>>
      %64 = tpu.memref_slice %arg9[%c17_i32] : memref<32x!tpu.dma_semaphore, #tpu.memory_space<semaphore_mem>> -> memref<1x!tpu.dma_semaphore, #tpu.memory_space<semaphore_mem>>
      %65 = tpu.memref_squeeze %64 : memref<1x!tpu.dma_semaphore, #tpu.memory_space<semaphore_mem>> -> memref<!tpu.dma_semaphore, #tpu.memory_space<semaphore_mem>>
      tpu.enqueue_dma source(%62 : memref<1x128xf32, #tpu.memory_space<any>>) target(%63 : memref<1x128xf32, #tpu.memory_space<vmem>>) target_semaphore(%65 : memref<!tpu.dma_semaphore, #tpu.memory_space<semaphore_mem>>)
      %c8_i32_48 = arith.constant 8 : i32
      %66 = arith.muli %arg0, %c8_i32_48 : i32
      %c1_i32_49 = arith.constant 1 : i32
      %67 = arith.addi %66, %c1_i32_49 : i32
      %68 = arith.index_cast %67 : i32 to index
      %c3_50 = arith.constant 3 : index
      %69 = memref.load %arg2[%68, %c3_50] : memref<8x4xi32, #tpu.memory_space<smem>>
      %c25_i32 = arith.constant 25 : i32
      %c0_i32_51 = arith.constant 0 : i32
      %70 = tpu.memref_slice %arg3[%69, %c0_i32_51] : memref<64x128xf32, #tpu.memory_space<any>> -> memref<1x128xf32, #tpu.memory_space<any>>
      %c25_i32_52 = arith.constant 25 : i32
      %c0_i32_53 = arith.constant 0 : i32
      %71 = tpu.memref_slice %arg7[%c25_i32_52, %c0_i32_53] : memref<32x128xf32, #tpu.memory_space<vmem>> -> memref<1x128xf32, #tpu.memory_space<vmem>>
      %72 = tpu.memref_slice %arg9[%c25_i32] : memref<32x!tpu.dma_semaphore, #tpu.memory_space<semaphore_mem>> -> memref<1x!tpu.dma_semaphore, #tpu.memory_space<semaphore_mem>>
      %73 = tpu.memref_squeeze %72 : memref<1x!tpu.dma_semaphore, #tpu.memory_space<semaphore_mem>> -> memref<!tpu.dma_semaphore, #tpu.memory_space<semaphore_mem>>
      tpu.enqueue_dma source(%70 : memref<1x128xf32, #tpu.memory_space<any>>) target(%71 : memref<1x128xf32, #tpu.memory_space<vmem>>) target_semaphore(%73 : memref<!tpu.dma_semaphore, #tpu.memory_space<semaphore_mem>>)
      %c8_i32_54 = arith.constant 8 : i32
      %74 = arith.muli %arg0, %c8_i32_54 : i32
      %c2_i32 = arith.constant 2 : i32
      %75 = arith.addi %74, %c2_i32 : i32
      %76 = arith.index_cast %75 : i32 to index
      %c0_55 = arith.constant 0 : index
      %77 = memref.load %arg2[%76, %c0_55] : memref<8x4xi32, #tpu.memory_space<smem>>
      %c2_i32_56 = arith.constant 2 : i32
      %c0_i32_57 = arith.constant 0 : i32
      %78 = tpu.memref_slice %arg3[%77, %c0_i32_57] : memref<64x128xf32, #tpu.memory_space<any>> -> memref<1x128xf32, #tpu.memory_space<any>>
      %c2_i32_58 = arith.constant 2 : i32
      %c0_i32_59 = arith.constant 0 : i32
      %79 = tpu.memref_slice %arg7[%c2_i32_58, %c0_i32_59] : memref<32x128xf32, #tpu.memory_space<vmem>> -> memref<1x128xf32, #tpu.memory_space<vmem>>
      %80 = tpu.memref_slice %arg9[%c2_i32_56] : memref<32x!tpu.dma_semaphore, #tpu.memory_space<semaphore_mem>> -> memref<1x!tpu.dma_semaphore, #tpu.memory_space<semaphore_mem>>
      %81 = tpu.memref_squeeze %80 : memref<1x!tpu.dma_semaphore, #tpu.memory_space<semaphore_mem>> -> memref<!tpu.dma_semaphore, #tpu.memory_space<semaphore_mem>>
      tpu.enqueue_dma source(%78 : memref<1x128xf32, #tpu.memory_space<any>>) target(%79 : memref<1x128xf32, #tpu.memory_space<vmem>>) target_semaphore(%81 : memref<!tpu.dma_semaphore, #tpu.memory_space<semaphore_mem>>)
      %c8_i32_60 = arith.constant 8 : i32
      %82 = arith.muli %arg0, %c8_i32_60 : i32
      %c2_i32_61 = arith.constant 2 : i32
      %83 = arith.addi %82, %c2_i32_61 : i32
      %84 = arith.index_cast %83 : i32 to index
      %c1_62 = arith.constant 1 : index
      %85 = memref.load %arg2[%84, %c1_62] : memref<8x4xi32, #tpu.memory_space<smem>>
      %c10_i32 = arith.constant 10 : i32
      %c0_i32_63 = arith.constant 0 : i32
      %86 = tpu.memref_slice %arg3[%85, %c0_i32_63] : memref<64x128xf32, #tpu.memory_space<any>> -> memref<1x128xf32, #tpu.memory_space<any>>
      %c10_i32_64 = arith.constant 10 : i32
      %c0_i32_65 = arith.constant 0 : i32
      %87 = tpu.memref_slice %arg7[%c10_i32_64, %c0_i32_65] : memref<32x128xf32, #tpu.memory_space<vmem>> -> memref<1x128xf32, #tpu.memory_space<vmem>>
      %88 = tpu.memref_slice %arg9[%c10_i32] : memref<32x!tpu.dma_semaphore, #tpu.memory_space<semaphore_mem>> -> memref<1x!tpu.dma_semaphore, #tpu.memory_space<semaphore_mem>>
      %89 = tpu.memref_squeeze %88 : memref<1x!tpu.dma_semaphore, #tpu.memory_space<semaphore_mem>> -> memref<!tpu.dma_semaphore, #tpu.memory_space<semaphore_mem>>
      tpu.enqueue_dma source(%86 : memref<1x128xf32, #tpu.memory_space<any>>) target(%87 : memref<1x128xf32, #tpu.memory_space<vmem>>) target_semaphore(%89 : memref<!tpu.dma_semaphore, #tpu.memory_space<semaphore_mem>>)
      %c8_i32_66 = arith.constant 8 : i32
      %90 = arith.muli %arg0, %c8_i32_66 : i32
      %c2_i32_67 = arith.constant 2 : i32
      %91 = arith.addi %90, %c2_i32_67 : i32
      %92 = arith.index_cast %91 : i32 to index
      %c2_68 = arith.constant 2 : index
      %93 = memref.load %arg2[%92, %c2_68] : memref<8x4xi32, #tpu.memory_space<smem>>
      %c18_i32 = arith.constant 18 : i32
      %c0_i32_69 = arith.constant 0 : i32
      %94 = tpu.memref_slice %arg3[%93, %c0_i32_69] : memref<64x128xf32, #tpu.memory_space<any>> -> memref<1x128xf32, #tpu.memory_space<any>>
      %c18_i32_70 = arith.constant 18 : i32
      %c0_i32_71 = arith.constant 0 : i32
      %95 = tpu.memref_slice %arg7[%c18_i32_70, %c0_i32_71] : memref<32x128xf32, #tpu.memory_space<vmem>> -> memref<1x128xf32, #tpu.memory_space<vmem>>
      %96 = tpu.memref_slice %arg9[%c18_i32] : memref<32x!tpu.dma_semaphore, #tpu.memory_space<semaphore_mem>> -> memref<1x!tpu.dma_semaphore, #tpu.memory_space<semaphore_mem>>
      %97 = tpu.memref_squeeze %96 : memref<1x!tpu.dma_semaphore, #tpu.memory_space<semaphore_mem>> -> memref<!tpu.dma_semaphore, #tpu.memory_space<semaphore_mem>>
      tpu.enqueue_dma source(%94 : memref<1x128xf32, #tpu.memory_space<any>>) target(%95 : memref<1x128xf32, #tpu.memory_space<vmem>>) target_semaphore(%97 : memref<!tpu.dma_semaphore, #tpu.memory_space<semaphore_mem>>)
      %c8_i32_72 = arith.constant 8 : i32
      %98 = arith.muli %arg0, %c8_i32_72 : i32
      %c2_i32_73 = arith.constant 2 : i32
      %99 = arith.addi %98, %c2_i32_73 : i32
      %100 = arith.index_cast %99 : i32 to index
      %c3_74 = arith.constant 3 : index
      %101 = memref.load %arg2[%100, %c3_74] : memref<8x4xi32, #tpu.memory_space<smem>>
      %c26_i32 = arith.constant 26 : i32
      %c0_i32_75 = arith.constant 0 : i32
      %102 = tpu.memref_slice %arg3[%101, %c0_i32_75] : memref<64x128xf32, #tpu.memory_space<any>> -> memref<1x128xf32, #tpu.memory_space<any>>
      %c26_i32_76 = arith.constant 26 : i32
      %c0_i32_77 = arith.constant 0 : i32
      %103 = tpu.memref_slice %arg7[%c26_i32_76, %c0_i32_77] : memref<32x128xf32, #tpu.memory_space<vmem>> -> memref<1x128xf32, #tpu.memory_space<vmem>>
      %104 = tpu.memref_slice %arg9[%c26_i32] : memref<32x!tpu.dma_semaphore, #tpu.memory_space<semaphore_mem>> -> memref<1x!tpu.dma_semaphore, #tpu.memory_space<semaphore_mem>>
      %105 = tpu.memref_squeeze %104 : memref<1x!tpu.dma_semaphore, #tpu.memory_space<semaphore_mem>> -> memref<!tpu.dma_semaphore, #tpu.memory_space<semaphore_mem>>
      tpu.enqueue_dma source(%102 : memref<1x128xf32, #tpu.memory_space<any>>) target(%103 : memref<1x128xf32, #tpu.memory_space<vmem>>) target_semaphore(%105 : memref<!tpu.dma_semaphore, #tpu.memory_space<semaphore_mem>>)
      %c8_i32_78 = arith.constant 8 : i32
      %106 = arith.muli %arg0, %c8_i32_78 : i32
      %c3_i32 = arith.constant 3 : i32
      %107 = arith.addi %106, %c3_i32 : i32
      %108 = arith.index_cast %107 : i32 to index
      %c0_79 = arith.constant 0 : index
      %109 = memref.load %arg2[%108, %c0_79] : memref<8x4xi32, #tpu.memory_space<smem>>
      %c3_i32_80 = arith.constant 3 : i32
      %c0_i32_81 = arith.constant 0 : i32
      %110 = tpu.memref_slice %arg3[%109, %c0_i32_81] : memref<64x128xf32, #tpu.memory_space<any>> -> memref<1x128xf32, #tpu.memory_space<any>>
      %c3_i32_82 = arith.constant 3 : i32
      %c0_i32_83 = arith.constant 0 : i32
      %111 = tpu.memref_slice %arg7[%c3_i32_82, %c0_i32_83] : memref<32x128xf32, #tpu.memory_space<vmem>> -> memref<1x128xf32, #tpu.memory_space<vmem>>
      %112 = tpu.memref_slice %arg9[%c3_i32_80] : memref<32x!tpu.dma_semaphore, #tpu.memory_space<semaphore_mem>> -> memref<1x!tpu.dma_semaphore, #tpu.memory_space<semaphore_mem>>
      %113 = tpu.memref_squeeze %112 : memref<1x!tpu.dma_semaphore, #tpu.memory_space<semaphore_mem>> -> memref<!tpu.dma_semaphore, #tpu.memory_space<semaphore_mem>>
      tpu.enqueue_dma source(%110 : memref<1x128xf32, #tpu.memory_space<any>>) target(%111 : memref<1x128xf32, #tpu.memory_space<vmem>>) target_semaphore(%113 : memref<!tpu.dma_semaphore, #tpu.memory_space<semaphore_mem>>)
      %c8_i32_84 = arith.constant 8 : i32
      %114 = arith.muli %arg0, %c8_i32_84 : i32
      %c3_i32_85 = arith.constant 3 : i32
      %115 = arith.addi %114, %c3_i32_85 : i32
      %116 = arith.index_cast %115 : i32 to index
      %c1_86 = arith.constant 1 : index
      %117 = memref.load %arg2[%116, %c1_86] : memref<8x4xi32, #tpu.memory_space<smem>>
      %c11_i32 = arith.constant 11 : i32
      %c0_i32_87 = arith.constant 0 : i32
      %118 = tpu.memref_slice %arg3[%117, %c0_i32_87] : memref<64x128xf32, #tpu.memory_space<any>> -> memref<1x128xf32, #tpu.memory_space<any>>
      %c11_i32_88 = arith.constant 11 : i32
      %c0_i32_89 = arith.constant 0 : i32
      %119 = tpu.memref_slice %arg7[%c11_i32_88, %c0_i32_89] : memref<32x128xf32, #tpu.memory_space<vmem>> -> memref<1x128xf32, #tpu.memory_space<vmem>>
      %120 = tpu.memref_slice %arg9[%c11_i32] : memref<32x!tpu.dma_semaphore, #tpu.memory_space<semaphore_mem>> -> memref<1x!tpu.dma_semaphore, #tpu.memory_space<semaphore_mem>>
      %121 = tpu.memref_squeeze %120 : memref<1x!tpu.dma_semaphore, #tpu.memory_space<semaphore_mem>> -> memref<!tpu.dma_semaphore, #tpu.memory_space<semaphore_mem>>
      tpu.enqueue_dma source(%118 : memref<1x128xf32, #tpu.memory_space<any>>) target(%119 : memref<1x128xf32, #tpu.memory_space<vmem>>) target_semaphore(%121 : memref<!tpu.dma_semaphore, #tpu.memory_space<semaphore_mem>>)
      %c8_i32_90 = arith.constant 8 : i32
      %122 = arith.muli %arg0, %c8_i32_90 : i32
      %c3_i32_91 = arith.constant 3 : i32
      %123 = arith.addi %122, %c3_i32_91 : i32
      %124 = arith.index_cast %123 : i32 to index
      %c2_92 = arith.constant 2 : index
      %125 = memref.load %arg2[%124, %c2_92] : memref<8x4xi32, #tpu.memory_space<smem>>
      %c19_i32 = arith.constant 19 : i32
      %c0_i32_93 = arith.constant 0 : i32
      %126 = tpu.memref_slice %arg3[%125, %c0_i32_93] : memref<64x128xf32, #tpu.memory_space<any>> -> memref<1x128xf32, #tpu.memory_space<any>>
      %c19_i32_94 = arith.constant 19 : i32
      %c0_i32_95 = arith.constant 0 : i32
      %127 = tpu.memref_slice %arg7[%c19_i32_94, %c0_i32_95] : memref<32x128xf32, #tpu.memory_space<vmem>> -> memref<1x128xf32, #tpu.memory_space<vmem>>
      %128 = tpu.memref_slice %arg9[%c19_i32] : memref<32x!tpu.dma_semaphore, #tpu.memory_space<semaphore_mem>> -> memref<1x!tpu.dma_semaphore, #tpu.memory_space<semaphore_mem>>
      %129 = tpu.memref_squeeze %128 : memref<1x!tpu.dma_semaphore, #tpu.memory_space<semaphore_mem>> -> memref<!tpu.dma_semaphore, #tpu.memory_space<semaphore_mem>>
      tpu.enqueue_dma source(%126 : memref<1x128xf32, #tpu.memory_space<any>>) target(%127 : memref<1x128xf32, #tpu.memory_space<vmem>>) target_semaphore(%129 : memref<!tpu.dma_semaphore, #tpu.memory_space<semaphore_mem>>)
      %c8_i32_96 = arith.constant 8 : i32
      %130 = arith.muli %arg0, %c8_i32_96 : i32
      %c3_i32_97 = arith.constant 3 : i32
      %131 = arith.addi %130, %c3_i32_97 : i32
      %132 = arith.index_cast %131 : i32 to index
      %c3_98 = arith.constant 3 : index
      %133 = memref.load %arg2[%132, %c3_98] : memref<8x4xi32, #tpu.memory_space<smem>>
      %c27_i32 = arith.constant 27 : i32
      %c0_i32_99 = arith.constant 0 : i32
      %134 = tpu.memref_slice %arg3[%133, %c0_i32_99] : memref<64x128xf32, #tpu.memory_space<any>> -> memref<1x128xf32, #tpu.memory_space<any>>
      %c27_i32_100 = arith.constant 27 : i32
      %c0_i32_101 = arith.constant 0 : i32
      %135 = tpu.memref_slice %arg7[%c27_i32_100, %c0_i32_101] : memref<32x128xf32, #tpu.memory_space<vmem>> -> memref<1x128xf32, #tpu.memory_space<vmem>>
      %136 = tpu.memref_slice %arg9[%c27_i32] : memref<32x!tpu.dma_semaphore, #tpu.memory_space<semaphore_mem>> -> memref<1x!tpu.dma_semaphore, #tpu.memory_space<semaphore_mem>>
      %137 = tpu.memref_squeeze %136 : memref<1x!tpu.dma_semaphore, #tpu.memory_space<semaphore_mem>> -> memref<!tpu.dma_semaphore, #tpu.memory_space<semaphore_mem>>
      tpu.enqueue_dma source(%134 : memref<1x128xf32, #tpu.memory_space<any>>) target(%135 : memref<1x128xf32, #tpu.memory_space<vmem>>) target_semaphore(%137 : memref<!tpu.dma_semaphore, #tpu.memory_space<semaphore_mem>>)
      %c8_i32_102 = arith.constant 8 : i32
      %138 = arith.muli %arg0, %c8_i32_102 : i32
      %c4_i32 = arith.constant 4 : i32
      %139 = arith.addi %138, %c4_i32 : i32
      %140 = arith.index_cast %139 : i32 to index
      %c0_103 = arith.constant 0 : index
      %141 = memref.load %arg2[%140, %c0_103] : memref<8x4xi32, #tpu.memory_space<smem>>
      %c4_i32_104 = arith.constant 4 : i32
      %c0_i32_105 = arith.constant 0 : i32
      %142 = tpu.memref_slice %arg3[%141, %c0_i32_105] : memref<64x128xf32, #tpu.memory_space<any>> -> memref<1x128xf32, #tpu.memory_space<any>>
      %c4_i32_106 = arith.constant 4 : i32
      %c0_i32_107 = arith.constant 0 : i32
      %143 = tpu.memref_slice %arg7[%c4_i32_106, %c0_i32_107] : memref<32x128xf32, #tpu.memory_space<vmem>> -> memref<1x128xf32, #tpu.memory_space<vmem>>
      %144 = tpu.memref_slice %arg9[%c4_i32_104] : memref<32x!tpu.dma_semaphore, #tpu.memory_space<semaphore_mem>> -> memref<1x!tpu.dma_semaphore, #tpu.memory_space<semaphore_mem>>
      %145 = tpu.memref_squeeze %144 : memref<1x!tpu.dma_semaphore, #tpu.memory_space<semaphore_mem>> -> memref<!tpu.dma_semaphore, #tpu.memory_space<semaphore_mem>>
      tpu.enqueue_dma source(%142 : memref<1x128xf32, #tpu.memory_space<any>>) target(%143 : memref<1x128xf32, #tpu.memory_space<vmem>>) target_semaphore(%145 : memref<!tpu.dma_semaphore, #tpu.memory_space<semaphore_mem>>)
      %c8_i32_108 = arith.constant 8 : i32
      %146 = arith.muli %arg0, %c8_i32_108 : i32
      %c4_i32_109 = arith.constant 4 : i32
      %147 = arith.addi %146, %c4_i32_109 : i32
      %148 = arith.index_cast %147 : i32 to index
      %c1_110 = arith.constant 1 : index
      %149 = memref.load %arg2[%148, %c1_110] : memref<8x4xi32, #tpu.memory_space<smem>>
      %c12_i32 = arith.constant 12 : i32
      %c0_i32_111 = arith.constant 0 : i32
      %150 = tpu.memref_slice %arg3[%149, %c0_i32_111] : memref<64x128xf32, #tpu.memory_space<any>> -> memref<1x128xf32, #tpu.memory_space<any>>
      %c12_i32_112 = arith.constant 12 : i32
      %c0_i32_113 = arith.constant 0 : i32
      %151 = tpu.memref_slice %arg7[%c12_i32_112, %c0_i32_113] : memref<32x128xf32, #tpu.memory_space<vmem>> -> memref<1x128xf32, #tpu.memory_space<vmem>>
      %152 = tpu.memref_slice %arg9[%c12_i32] : memref<32x!tpu.dma_semaphore, #tpu.memory_space<semaphore_mem>> -> memref<1x!tpu.dma_semaphore, #tpu.memory_space<semaphore_mem>>
      %153 = tpu.memref_squeeze %152 : memref<1x!tpu.dma_semaphore, #tpu.memory_space<semaphore_mem>> -> memref<!tpu.dma_semaphore, #tpu.memory_space<semaphore_mem>>
      tpu.enqueue_dma source(%150 : memref<1x128xf32, #tpu.memory_space<any>>) target(%151 : memref<1x128xf32, #tpu.memory_space<vmem>>) target_semaphore(%153 : memref<!tpu.dma_semaphore, #tpu.memory_space<semaphore_mem>>)
      %c8_i32_114 = arith.constant 8 : i32
      %154 = arith.muli %arg0, %c8_i32_114 : i32
      %c4_i32_115 = arith.constant 4 : i32
      %155 = arith.addi %154, %c4_i32_115 : i32
      %156 = arith.index_cast %155 : i32 to index
      %c2_116 = arith.constant 2 : index
      %157 = memref.load %arg2[%156, %c2_116] : memref<8x4xi32, #tpu.memory_space<smem>>
      %c20_i32 = arith.constant 20 : i32
      %c0_i32_117 = arith.constant 0 : i32
      %158 = tpu.memref_slice %arg3[%157, %c0_i32_117] : memref<64x128xf32, #tpu.memory_space<any>> -> memref<1x128xf32, #tpu.memory_space<any>>
      %c20_i32_118 = arith.constant 20 : i32
      %c0_i32_119 = arith.constant 0 : i32
      %159 = tpu.memref_slice %arg7[%c20_i32_118, %c0_i32_119] : memref<32x128xf32, #tpu.memory_space<vmem>> -> memref<1x128xf32, #tpu.memory_space<vmem>>
      %160 = tpu.memref_slice %arg9[%c20_i32] : memref<32x!tpu.dma_semaphore, #tpu.memory_space<semaphore_mem>> -> memref<1x!tpu.dma_semaphore, #tpu.memory_space<semaphore_mem>>
      %161 = tpu.memref_squeeze %160 : memref<1x!tpu.dma_semaphore, #tpu.memory_space<semaphore_mem>> -> memref<!tpu.dma_semaphore, #tpu.memory_space<semaphore_mem>>
      tpu.enqueue_dma source(%158 : memref<1x128xf32, #tpu.memory_space<any>>) target(%159 : memref<1x128xf32, #tpu.memory_space<vmem>>) target_semaphore(%161 : memref<!tpu.dma_semaphore, #tpu.memory_space<semaphore_mem>>)
      %c8_i32_120 = arith.constant 8 : i32
      %162 = arith.muli %arg0, %c8_i32_120 : i32
      %c4_i32_121 = arith.constant 4 : i32
      %163 = arith.addi %162, %c4_i32_121 : i32
      %164 = arith.index_cast %163 : i32 to index
      %c3_122 = arith.constant 3 : index
      %165 = memref.load %arg2[%164, %c3_122] : memref<8x4xi32, #tpu.memory_space<smem>>
      %c28_i32 = arith.constant 28 : i32
      %c0_i32_123 = arith.constant 0 : i32
      %166 = tpu.memref_slice %arg3[%165, %c0_i32_123] : memref<64x128xf32, #tpu.memory_space<any>> -> memref<1x128xf32, #tpu.memory_space<any>>
      %c28_i32_124 = arith.constant 28 : i32
      %c0_i32_125 = arith.constant 0 : i32
      %167 = tpu.memref_slice %arg7[%c28_i32_124, %c0_i32_125] : memref<32x128xf32, #tpu.memory_space<vmem>> -> memref<1x128xf32, #tpu.memory_space<vmem>>
      %168 = tpu.memref_slice %arg9[%c28_i32] : memref<32x!tpu.dma_semaphore, #tpu.memory_space<semaphore_mem>> -> memref<1x!tpu.dma_semaphore, #tpu.memory_space<semaphore_mem>>
      %169 = tpu.memref_squeeze %168 : memref<1x!tpu.dma_semaphore, #tpu.memory_space<semaphore_mem>> -> memref<!tpu.dma_semaphore, #tpu.memory_space<semaphore_mem>>
      tpu.enqueue_dma source(%166 : memref<1x128xf32, #tpu.memory_space<any>>) target(%167 : memref<1x128xf32, #tpu.memory_space<vmem>>) target_semaphore(%169 : memref<!tpu.dma_semaphore, #tpu.memory_space<semaphore_mem>>)
      %c8_i32_126 = arith.constant 8 : i32
      %170 = arith.muli %arg0, %c8_i32_126 : i32
      %c5_i32 = arith.constant 5 : i32
      %171 = arith.addi %170, %c5_i32 : i32
      %172 = arith.index_cast %171 : i32 to index
      %c0_127 = arith.constant 0 : index
      %173 = memref.load %arg2[%172, %c0_127] : memref<8x4xi32, #tpu.memory_space<smem>>
      %c5_i32_128 = arith.constant 5 : i32
      %c0_i32_129 = arith.constant 0 : i32
      %174 = tpu.memref_slice %arg3[%173, %c0_i32_129] : memref<64x128xf32, #tpu.memory_space<any>> -> memref<1x128xf32, #tpu.memory_space<any>>
      %c5_i32_130 = arith.constant 5 : i32
      %c0_i32_131 = arith.constant 0 : i32
      %175 = tpu.memref_slice %arg7[%c5_i32_130, %c0_i32_131] : memref<32x128xf32, #tpu.memory_space<vmem>> -> memref<1x128xf32, #tpu.memory_space<vmem>>
      %176 = tpu.memref_slice %arg9[%c5_i32_128] : memref<32x!tpu.dma_semaphore, #tpu.memory_space<semaphore_mem>> -> memref<1x!tpu.dma_semaphore, #tpu.memory_space<semaphore_mem>>
      %177 = tpu.memref_squeeze %176 : memref<1x!tpu.dma_semaphore, #tpu.memory_space<semaphore_mem>> -> memref<!tpu.dma_semaphore, #tpu.memory_space<semaphore_mem>>
      tpu.enqueue_dma source(%174 : memref<1x128xf32, #tpu.memory_space<any>>) target(%175 : memref<1x128xf32, #tpu.memory_space<vmem>>) target_semaphore(%177 : memref<!tpu.dma_semaphore, #tpu.memory_space<semaphore_mem>>)
      %c8_i32_132 = arith.constant 8 : i32
      %178 = arith.muli %arg0, %c8_i32_132 : i32
      %c5_i32_133 = arith.constant 5 : i32
      %179 = arith.addi %178, %c5_i32_133 : i32
      %180 = arith.index_cast %179 : i32 to index
      %c1_134 = arith.constant 1 : index
      %181 = memref.load %arg2[%180, %c1_134] : memref<8x4xi32, #tpu.memory_space<smem>>
      %c13_i32 = arith.constant 13 : i32
      %c0_i32_135 = arith.constant 0 : i32
      %182 = tpu.memref_slice %arg3[%181, %c0_i32_135] : memref<64x128xf32, #tpu.memory_space<any>> -> memref<1x128xf32, #tpu.memory_space<any>>
      %c13_i32_136 = arith.constant 13 : i32
      %c0_i32_137 = arith.constant 0 : i32
      %183 = tpu.memref_slice %arg7[%c13_i32_136, %c0_i32_137] : memref<32x128xf32, #tpu.memory_space<vmem>> -> memref<1x128xf32, #tpu.memory_space<vmem>>
      %184 = tpu.memref_slice %arg9[%c13_i32] : memref<32x!tpu.dma_semaphore, #tpu.memory_space<semaphore_mem>> -> memref<1x!tpu.dma_semaphore, #tpu.memory_space<semaphore_mem>>
      %185 = tpu.memref_squeeze %184 : memref<1x!tpu.dma_semaphore, #tpu.memory_space<semaphore_mem>> -> memref<!tpu.dma_semaphore, #tpu.memory_space<semaphore_mem>>
      tpu.enqueue_dma source(%182 : memref<1x128xf32, #tpu.memory_space<any>>) target(%183 : memref<1x128xf32, #tpu.memory_space<vmem>>) target_semaphore(%185 : memref<!tpu.dma_semaphore, #tpu.memory_space<semaphore_mem>>)
      %c8_i32_138 = arith.constant 8 : i32
      %186 = arith.muli %arg0, %c8_i32_138 : i32
      %c5_i32_139 = arith.constant 5 : i32
      %187 = arith.addi %186, %c5_i32_139 : i32
      %188 = arith.index_cast %187 : i32 to index
      %c2_140 = arith.constant 2 : index
      %189 = memref.load %arg2[%188, %c2_140] : memref<8x4xi32, #tpu.memory_space<smem>>
      %c21_i32 = arith.constant 21 : i32
      %c0_i32_141 = arith.constant 0 : i32
      %190 = tpu.memref_slice %arg3[%189, %c0_i32_141] : memref<64x128xf32, #tpu.memory_space<any>> -> memref<1x128xf32, #tpu.memory_space<any>>
      %c21_i32_142 = arith.constant 21 : i32
      %c0_i32_143 = arith.constant 0 : i32
      %191 = tpu.memref_slice %arg7[%c21_i32_142, %c0_i32_143] : memref<32x128xf32, #tpu.memory_space<vmem>> -> memref<1x128xf32, #tpu.memory_space<vmem>>
      %192 = tpu.memref_slice %arg9[%c21_i32] : memref<32x!tpu.dma_semaphore, #tpu.memory_space<semaphore_mem>> -> memref<1x!tpu.dma_semaphore, #tpu.memory_space<semaphore_mem>>
      %193 = tpu.memref_squeeze %192 : memref<1x!tpu.dma_semaphore, #tpu.memory_space<semaphore_mem>> -> memref<!tpu.dma_semaphore, #tpu.memory_space<semaphore_mem>>
      tpu.enqueue_dma source(%190 : memref<1x128xf32, #tpu.memory_space<any>>) target(%191 : memref<1x128xf32, #tpu.memory_space<vmem>>) target_semaphore(%193 : memref<!tpu.dma_semaphore, #tpu.memory_space<semaphore_mem>>)
      %c8_i32_144 = arith.constant 8 : i32
      %194 = arith.muli %arg0, %c8_i32_144 : i32
      %c5_i32_145 = arith.constant 5 : i32
      %195 = arith.addi %194, %c5_i32_145 : i32
      %196 = arith.index_cast %195 : i32 to index
      %c3_146 = arith.constant 3 : index
      %197 = memref.load %arg2[%196, %c3_146] : memref<8x4xi32, #tpu.memory_space<smem>>
      %c29_i32 = arith.constant 29 : i32
      %c0_i32_147 = arith.constant 0 : i32
      %198 = tpu.memref_slice %arg3[%197, %c0_i32_147] : memref<64x128xf32, #tpu.memory_space<any>> -> memref<1x128xf32, #tpu.memory_space<any>>
      %c29_i32_148 = arith.constant 29 : i32
      %c0_i32_149 = arith.constant 0 : i32
      %199 = tpu.memref_slice %arg7[%c29_i32_148, %c0_i32_149] : memref<32x128xf32, #tpu.memory_space<vmem>> -> memref<1x128xf32, #tpu.memory_space<vmem>>
      %200 = tpu.memref_slice %arg9[%c29_i32] : memref<32x!tpu.dma_semaphore, #tpu.memory_space<semaphore_mem>> -> memref<1x!tpu.dma_semaphore, #tpu.memory_space<semaphore_mem>>
      %201 = tpu.memref_squeeze %200 : memref<1x!tpu.dma_semaphore, #tpu.memory_space<semaphore_mem>> -> memref<!tpu.dma_semaphore, #tpu.memory_space<semaphore_mem>>
      tpu.enqueue_dma source(%198 : memref<1x128xf32, #tpu.memory_space<any>>) target(%199 : memref<1x128xf32, #tpu.memory_space<vmem>>) target_semaphore(%201 : memref<!tpu.dma_semaphore, #tpu.memory_space<semaphore_mem>>)
      %c8_i32_150 = arith.constant 8 : i32
      %202 = arith.muli %arg0, %c8_i32_150 : i32
      %c6_i32 = arith.constant 6 : i32
      %203 = arith.addi %202, %c6_i32 : i32
      %204 = arith.index_cast %203 : i32 to index
      %c0_151 = arith.constant 0 : index
      %205 = memref.load %arg2[%204, %c0_151] : memref<8x4xi32, #tpu.memory_space<smem>>
      %c6_i32_152 = arith.constant 6 : i32
      %c0_i32_153 = arith.constant 0 : i32
      %206 = tpu.memref_slice %arg3[%205, %c0_i32_153] : memref<64x128xf32, #tpu.memory_space<any>> -> memref<1x128xf32, #tpu.memory_space<any>>
      %c6_i32_154 = arith.constant 6 : i32
      %c0_i32_155 = arith.constant 0 : i32
      %207 = tpu.memref_slice %arg7[%c6_i32_154, %c0_i32_155] : memref<32x128xf32, #tpu.memory_space<vmem>> -> memref<1x128xf32, #tpu.memory_space<vmem>>
      %208 = tpu.memref_slice %arg9[%c6_i32_152] : memref<32x!tpu.dma_semaphore, #tpu.memory_space<semaphore_mem>> -> memref<1x!tpu.dma_semaphore, #tpu.memory_space<semaphore_mem>>
      %209 = tpu.memref_squeeze %208 : memref<1x!tpu.dma_semaphore, #tpu.memory_space<semaphore_mem>> -> memref<!tpu.dma_semaphore, #tpu.memory_space<semaphore_mem>>
      tpu.enqueue_dma source(%206 : memref<1x128xf32, #tpu.memory_space<any>>) target(%207 : memref<1x128xf32, #tpu.memory_space<vmem>>) target_semaphore(%209 : memref<!tpu.dma_semaphore, #tpu.memory_space<semaphore_mem>>)
      %c8_i32_156 = arith.constant 8 : i32
      %210 = arith.muli %arg0, %c8_i32_156 : i32
      %c6_i32_157 = arith.constant 6 : i32
      %211 = arith.addi %210, %c6_i32_157 : i32
      %212 = arith.index_cast %211 : i32 to index
      %c1_158 = arith.constant 1 : index
      %213 = memref.load %arg2[%212, %c1_158] : memref<8x4xi32, #tpu.memory_space<smem>>
      %c14_i32 = arith.constant 14 : i32
      %c0_i32_159 = arith.constant 0 : i32
      %214 = tpu.memref_slice %arg3[%213, %c0_i32_159] : memref<64x128xf32, #tpu.memory_space<any>> -> memref<1x128xf32, #tpu.memory_space<any>>
      %c14_i32_160 = arith.constant 14 : i32
      %c0_i32_161 = arith.constant 0 : i32
      %215 = tpu.memref_slice %arg7[%c14_i32_160, %c0_i32_161] : memref<32x128xf32, #tpu.memory_space<vmem>> -> memref<1x128xf32, #tpu.memory_space<vmem>>
      %216 = tpu.memref_slice %arg9[%c14_i32] : memref<32x!tpu.dma_semaphore, #tpu.memory_space<semaphore_mem>> -> memref<1x!tpu.dma_semaphore, #tpu.memory_space<semaphore_mem>>
      %217 = tpu.memref_squeeze %216 : memref<1x!tpu.dma_semaphore, #tpu.memory_space<semaphore_mem>> -> memref<!tpu.dma_semaphore, #tpu.memory_space<semaphore_mem>>
      tpu.enqueue_dma source(%214 : memref<1x128xf32, #tpu.memory_space<any>>) target(%215 : memref<1x128xf32, #tpu.memory_space<vmem>>) target_semaphore(%217 : memref<!tpu.dma_semaphore, #tpu.memory_space<semaphore_mem>>)
      %c8_i32_162 = arith.constant 8 : i32
      %218 = arith.muli %arg0, %c8_i32_162 : i32
      %c6_i32_163 = arith.constant 6 : i32
      %219 = arith.addi %218, %c6_i32_163 : i32
      %220 = arith.index_cast %219 : i32 to index
      %c2_164 = arith.constant 2 : index
      %221 = memref.load %arg2[%220, %c2_164] : memref<8x4xi32, #tpu.memory_space<smem>>
      %c22_i32 = arith.constant 22 : i32
      %c0_i32_165 = arith.constant 0 : i32
      %222 = tpu.memref_slice %arg3[%221, %c0_i32_165] : memref<64x128xf32, #tpu.memory_space<any>> -> memref<1x128xf32, #tpu.memory_space<any>>
      %c22_i32_166 = arith.constant 22 : i32
      %c0_i32_167 = arith.constant 0 : i32
      %223 = tpu.memref_slice %arg7[%c22_i32_166, %c0_i32_167] : memref<32x128xf32, #tpu.memory_space<vmem>> -> memref<1x128xf32, #tpu.memory_space<vmem>>
      %224 = tpu.memref_slice %arg9[%c22_i32] : memref<32x!tpu.dma_semaphore, #tpu.memory_space<semaphore_mem>> -> memref<1x!tpu.dma_semaphore, #tpu.memory_space<semaphore_mem>>
      %225 = tpu.memref_squeeze %224 : memref<1x!tpu.dma_semaphore, #tpu.memory_space<semaphore_mem>> -> memref<!tpu.dma_semaphore, #tpu.memory_space<semaphore_mem>>
      tpu.enqueue_dma source(%222 : memref<1x128xf32, #tpu.memory_space<any>>) target(%223 : memref<1x128xf32, #tpu.memory_space<vmem>>) target_semaphore(%225 : memref<!tpu.dma_semaphore, #tpu.memory_space<semaphore_mem>>)
      %c8_i32_168 = arith.constant 8 : i32
      %226 = arith.muli %arg0, %c8_i32_168 : i32
      %c6_i32_169 = arith.constant 6 : i32
      %227 = arith.addi %226, %c6_i32_169 : i32
      %228 = arith.index_cast %227 : i32 to index
      %c3_170 = arith.constant 3 : index
      %229 = memref.load %arg2[%228, %c3_170] : memref<8x4xi32, #tpu.memory_space<smem>>
      %c30_i32 = arith.constant 30 : i32
      %c0_i32_171 = arith.constant 0 : i32
      %230 = tpu.memref_slice %arg3[%229, %c0_i32_171] : memref<64x128xf32, #tpu.memory_space<any>> -> memref<1x128xf32, #tpu.memory_space<any>>
      %c30_i32_172 = arith.constant 30 : i32
      %c0_i32_173 = arith.constant 0 : i32
      %231 = tpu.memref_slice %arg7[%c30_i32_172, %c0_i32_173] : memref<32x128xf32, #tpu.memory_space<vmem>> -> memref<1x128xf32, #tpu.memory_space<vmem>>
      %232 = tpu.memref_slice %arg9[%c30_i32] : memref<32x!tpu.dma_semaphore, #tpu.memory_space<semaphore_mem>> -> memref<1x!tpu.dma_semaphore, #tpu.memory_space<semaphore_mem>>
      %233 = tpu.memref_squeeze %232 : memref<1x!tpu.dma_semaphore, #tpu.memory_space<semaphore_mem>> -> memref<!tpu.dma_semaphore, #tpu.memory_space<semaphore_mem>>
      tpu.enqueue_dma source(%230 : memref<1x128xf32, #tpu.memory_space<any>>) target(%231 : memref<1x128xf32, #tpu.memory_space<vmem>>) target_semaphore(%233 : memref<!tpu.dma_semaphore, #tpu.memory_space<semaphore_mem>>)
      %c8_i32_174 = arith.constant 8 : i32
      %234 = arith.muli %arg0, %c8_i32_174 : i32
      %c7_i32 = arith.constant 7 : i32
      %235 = arith.addi %234, %c7_i32 : i32
      %236 = arith.index_cast %235 : i32 to index
      %c0_175 = arith.constant 0 : index
      %237 = memref.load %arg2[%236, %c0_175] : memref<8x4xi32, #tpu.memory_space<smem>>
      %c7_i32_176 = arith.constant 7 : i32
      %c0_i32_177 = arith.constant 0 : i32
      %238 = tpu.memref_slice %arg3[%237, %c0_i32_177] : memref<64x128xf32, #tpu.memory_space<any>> -> memref<1x128xf32, #tpu.memory_space<any>>
      %c7_i32_178 = arith.constant 7 : i32
      %c0_i32_179 = arith.constant 0 : i32
      %239 = tpu.memref_slice %arg7[%c7_i32_178, %c0_i32_179] : memref<32x128xf32, #tpu.memory_space<vmem>> -> memref<1x128xf32, #tpu.memory_space<vmem>>
      %240 = tpu.memref_slice %arg9[%c7_i32_176] : memref<32x!tpu.dma_semaphore, #tpu.memory_space<semaphore_mem>> -> memref<1x!tpu.dma_semaphore, #tpu.memory_space<semaphore_mem>>
      %241 = tpu.memref_squeeze %240 : memref<1x!tpu.dma_semaphore, #tpu.memory_space<semaphore_mem>> -> memref<!tpu.dma_semaphore, #tpu.memory_space<semaphore_mem>>
      tpu.enqueue_dma source(%238 : memref<1x128xf32, #tpu.memory_space<any>>) target(%239 : memref<1x128xf32, #tpu.memory_space<vmem>>) target_semaphore(%241 : memref<!tpu.dma_semaphore, #tpu.memory_space<semaphore_mem>>)
      %c8_i32_180 = arith.constant 8 : i32
      %242 = arith.muli %arg0, %c8_i32_180 : i32
      %c7_i32_181 = arith.constant 7 : i32
      %243 = arith.addi %242, %c7_i32_181 : i32
      %244 = arith.index_cast %243 : i32 to index
      %c1_182 = arith.constant 1 : index
      %245 = memref.load %arg2[%244, %c1_182] : memref<8x4xi32, #tpu.memory_space<smem>>
      %c15_i32 = arith.constant 15 : i32
      %c0_i32_183 = arith.constant 0 : i32
      %246 = tpu.memref_slice %arg3[%245, %c0_i32_183] : memref<64x128xf32, #tpu.memory_space<any>> -> memref<1x128xf32, #tpu.memory_space<any>>
      %c15_i32_184 = arith.constant 15 : i32
      %c0_i32_185 = arith.constant 0 : i32
      %247 = tpu.memref_slice %arg7[%c15_i32_184, %c0_i32_185] : memref<32x128xf32, #tpu.memory_space<vmem>> -> memref<1x128xf32, #tpu.memory_space<vmem>>
      %248 = tpu.memref_slice %arg9[%c15_i32] : memref<32x!tpu.dma_semaphore, #tpu.memory_space<semaphore_mem>> -> memref<1x!tpu.dma_semaphore, #tpu.memory_space<semaphore_mem>>
      %249 = tpu.memref_squeeze %248 : memref<1x!tpu.dma_semaphore, #tpu.memory_space<semaphore_mem>> -> memref<!tpu.dma_semaphore, #tpu.memory_space<semaphore_mem>>
      tpu.enqueue_dma source(%246 : memref<1x128xf32, #tpu.memory_space<any>>) target(%247 : memref<1x128xf32, #tpu.memory_space<vmem>>) target_semaphore(%249 : memref<!tpu.dma_semaphore, #tpu.memory_space<semaphore_mem>>)
      %c8_i32_186 = arith.constant 8 : i32
      %250 = arith.muli %arg0, %c8_i32_186 : i32
      %c7_i32_187 = arith.constant 7 : i32
      %251 = arith.addi %250, %c7_i32_187 : i32
      %252 = arith.index_cast %251 : i32 to index
      %c2_188 = arith.constant 2 : index
      %253 = memref.load %arg2[%252, %c2_188] : memref<8x4xi32, #tpu.memory_space<smem>>
      %c23_i32 = arith.constant 23 : i32
      %c0_i32_189 = arith.constant 0 : i32
      %254 = tpu.memref_slice %arg3[%253, %c0_i32_189] : memref<64x128xf32, #tpu.memory_space<any>> -> memref<1x128xf32, #tpu.memory_space<any>>
      %c23_i32_190 = arith.constant 23 : i32
      %c0_i32_191 = arith.constant 0 : i32
      %255 = tpu.memref_slice %arg7[%c23_i32_190, %c0_i32_191] : memref<32x128xf32, #tpu.memory_space<vmem>> -> memref<1x128xf32, #tpu.memory_space<vmem>>
      %256 = tpu.memref_slice %arg9[%c23_i32] : memref<32x!tpu.dma_semaphore, #tpu.memory_space<semaphore_mem>> -> memref<1x!tpu.dma_semaphore, #tpu.memory_space<semaphore_mem>>
      %257 = tpu.memref_squeeze %256 : memref<1x!tpu.dma_semaphore, #tpu.memory_space<semaphore_mem>> -> memref<!tpu.dma_semaphore, #tpu.memory_space<semaphore_mem>>
      tpu.enqueue_dma source(%254 : memref<1x128xf32, #tpu.memory_space<any>>) target(%255 : memref<1x128xf32, #tpu.memory_space<vmem>>) target_semaphore(%257 : memref<!tpu.dma_semaphore, #tpu.memory_space<semaphore_mem>>)
      %c8_i32_192 = arith.constant 8 : i32
      %258 = arith.muli %arg0, %c8_i32_192 : i32
      %c7_i32_193 = arith.constant 7 : i32
      %259 = arith.addi %258, %c7_i32_193 : i32
      %260 = arith.index_cast %259 : i32 to index
      %c3_194 = arith.constant 3 : index
      %261 = memref.load %arg2[%260, %c3_194] : memref<8x4xi32, #tpu.memory_space<smem>>
      %c31_i32 = arith.constant 31 : i32
      %c0_i32_195 = arith.constant 0 : i32
      %262 = tpu.memref_slice %arg3[%261, %c0_i32_195] : memref<64x128xf32, #tpu.memory_space<any>> -> memref<1x128xf32, #tpu.memory_space<any>>
      %c31_i32_196 = arith.constant 31 : i32
      %c0_i32_197 = arith.constant 0 : i32
      %263 = tpu.memref_slice %arg7[%c31_i32_196, %c0_i32_197] : memref<32x128xf32, #tpu.memory_space<vmem>> -> memref<1x128xf32, #tpu.memory_space<vmem>>
      %264 = tpu.memref_slice %arg9[%c31_i32] : memref<32x!tpu.dma_semaphore, #tpu.memory_space<semaphore_mem>> -> memref<1x!tpu.dma_semaphore, #tpu.memory_space<semaphore_mem>>
      %265 = tpu.memref_squeeze %264 : memref<1x!tpu.dma_semaphore, #tpu.memory_space<semaphore_mem>> -> memref<!tpu.dma_semaphore, #tpu.memory_space<semaphore_mem>>
      tpu.enqueue_dma source(%262 : memref<1x128xf32, #tpu.memory_space<any>>) target(%263 : memref<1x128xf32, #tpu.memory_space<vmem>>) target_semaphore(%265 : memref<!tpu.dma_semaphore, #tpu.memory_space<semaphore_mem>>)
      %c0_i32_198 = arith.constant 0 : i32
      %c0_i32_199 = arith.constant 0 : i32
      %c0_i32_200 = arith.constant 0 : i32
      %266 = tpu.memref_slice %arg3[%c0_i32_199, %c0_i32_200] : memref<64x128xf32, #tpu.memory_space<any>> -> memref<1x128xf32, #tpu.memory_space<any>>
      %c0_i32_201 = arith.constant 0 : i32
      %c0_i32_202 = arith.constant 0 : i32
      %267 = tpu.memref_slice %arg7[%c0_i32_201, %c0_i32_202] : memref<32x128xf32, #tpu.memory_space<vmem>> -> memref<1x128xf32, #tpu.memory_space<vmem>>
      %268 = tpu.memref_slice %arg9[%c0_i32_198] : memref<32x!tpu.dma_semaphore, #tpu.memory_space<semaphore_mem>> -> memref<1x!tpu.dma_semaphore, #tpu.memory_space<semaphore_mem>>
      %269 = tpu.memref_squeeze %268 : memref<1x!tpu.dma_semaphore, #tpu.memory_space<semaphore_mem>> -> memref<!tpu.dma_semaphore, #tpu.memory_space<semaphore_mem>>
      tpu.wait_dma2 semaphore(%269 : memref<!tpu.dma_semaphore, #tpu.memory_space<semaphore_mem>>) src(%266 : memref<1x128xf32, #tpu.memory_space<any>>) dst(%267 : memref<1x128xf32, #tpu.memory_space<vmem>>)
      %c8_i32_203 = arith.constant 8 : i32
      %c0_i32_204 = arith.constant 0 : i32
      %c0_i32_205 = arith.constant 0 : i32
      %270 = tpu.memref_slice %arg3[%c0_i32_204, %c0_i32_205] : memref<64x128xf32, #tpu.memory_space<any>> -> memref<1x128xf32, #tpu.memory_space<any>>
      %c8_i32_206 = arith.constant 8 : i32
      %c0_i32_207 = arith.constant 0 : i32
      %271 = tpu.memref_slice %arg7[%c8_i32_206, %c0_i32_207] : memref<32x128xf32, #tpu.memory_space<vmem>> -> memref<1x128xf32, #tpu.memory_space<vmem>>
      %272 = tpu.memref_slice %arg9[%c8_i32_203] : memref<32x!tpu.dma_semaphore, #tpu.memory_space<semaphore_mem>> -> memref<1x!tpu.dma_semaphore, #tpu.memory_space<semaphore_mem>>
      %273 = tpu.memref_squeeze %272 : memref<1x!tpu.dma_semaphore, #tpu.memory_space<semaphore_mem>> -> memref<!tpu.dma_semaphore, #tpu.memory_space<semaphore_mem>>
      tpu.wait_dma2 semaphore(%273 : memref<!tpu.dma_semaphore, #tpu.memory_space<semaphore_mem>>) src(%270 : memref<1x128xf32, #tpu.memory_space<any>>) dst(%271 : memref<1x128xf32, #tpu.memory_space<vmem>>)
      %c16_i32_208 = arith.constant 16 : i32
      %c0_i32_209 = arith.constant 0 : i32
      %c0_i32_210 = arith.constant 0 : i32
      %274 = tpu.memref_slice %arg3[%c0_i32_209, %c0_i32_210] : memref<64x128xf32, #tpu.memory_space<any>> -> memref<1x128xf32, #tpu.memory_space<any>>
      %c16_i32_211 = arith.constant 16 : i32
      %c0_i32_212 = arith.constant 0 : i32
      %275 = tpu.memref_slice %arg7[%c16_i32_211, %c0_i32_212] : memref<32x128xf32, #tpu.memory_space<vmem>> -> memref<1x128xf32, #tpu.memory_space<vmem>>
      %276 = tpu.memref_slice %arg9[%c16_i32_208] : memref<32x!tpu.dma_semaphore, #tpu.memory_space<semaphore_mem>> -> memref<1x!tpu.dma_semaphore, #tpu.memory_space<semaphore_mem>>
      %277 = tpu.memref_squeeze %276 : memref<1x!tpu.dma_semaphore, #tpu.memory_space<semaphore_mem>> -> memref<!tpu.dma_semaphore, #tpu.memory_space<semaphore_mem>>
      tpu.wait_dma2 semaphore(%277 : memref<!tpu.dma_semaphore, #tpu.memory_space<semaphore_mem>>) src(%274 : memref<1x128xf32, #tpu.memory_space<any>>) dst(%275 : memref<1x128xf32, #tpu.memory_space<vmem>>)
      %c24_i32_213 = arith.constant 24 : i32
      %c0_i32_214 = arith.constant 0 : i32
      %c0_i32_215 = arith.constant 0 : i32
      %278 = tpu.memref_slice %arg3[%c0_i32_214, %c0_i32_215] : memref<64x128xf32, #tpu.memory_space<any>> -> memref<1x128xf32, #tpu.memory_space<any>>
      %c24_i32_216 = arith.constant 24 : i32
      %c0_i32_217 = arith.constant 0 : i32
      %279 = tpu.memref_slice %arg7[%c24_i32_216, %c0_i32_217] : memref<32x128xf32, #tpu.memory_space<vmem>> -> memref<1x128xf32, #tpu.memory_space<vmem>>
      %280 = tpu.memref_slice %arg9[%c24_i32_213] : memref<32x!tpu.dma_semaphore, #tpu.memory_space<semaphore_mem>> -> memref<1x!tpu.dma_semaphore, #tpu.memory_space<semaphore_mem>>
      %281 = tpu.memref_squeeze %280 : memref<1x!tpu.dma_semaphore, #tpu.memory_space<semaphore_mem>> -> memref<!tpu.dma_semaphore, #tpu.memory_space<semaphore_mem>>
      tpu.wait_dma2 semaphore(%281 : memref<!tpu.dma_semaphore, #tpu.memory_space<semaphore_mem>>) src(%278 : memref<1x128xf32, #tpu.memory_space<any>>) dst(%279 : memref<1x128xf32, #tpu.memory_space<vmem>>)
      %c1_i32_218 = arith.constant 1 : i32
      %c0_i32_219 = arith.constant 0 : i32
      %c0_i32_220 = arith.constant 0 : i32
      %282 = tpu.memref_slice %arg3[%c0_i32_219, %c0_i32_220] : memref<64x128xf32, #tpu.memory_space<any>> -> memref<1x128xf32, #tpu.memory_space<any>>
      %c1_i32_221 = arith.constant 1 : i32
      %c0_i32_222 = arith.constant 0 : i32
      %283 = tpu.memref_slice %arg7[%c1_i32_221, %c0_i32_222] : memref<32x128xf32, #tpu.memory_space<vmem>> -> memref<1x128xf32, #tpu.memory_space<vmem>>
      %284 = tpu.memref_slice %arg9[%c1_i32_218] : memref<32x!tpu.dma_semaphore, #tpu.memory_space<semaphore_mem>> -> memref<1x!tpu.dma_semaphore, #tpu.memory_space<semaphore_mem>>
      %285 = tpu.memref_squeeze %284 : memref<1x!tpu.dma_semaphore, #tpu.memory_space<semaphore_mem>> -> memref<!tpu.dma_semaphore, #tpu.memory_space<semaphore_mem>>
      tpu.wait_dma2 semaphore(%285 : memref<!tpu.dma_semaphore, #tpu.memory_space<semaphore_mem>>) src(%282 : memref<1x128xf32, #tpu.memory_space<any>>) dst(%283 : memref<1x128xf32, #tpu.memory_space<vmem>>)
      %c9_i32_223 = arith.constant 9 : i32
      %c0_i32_224 = arith.constant 0 : i32
      %c0_i32_225 = arith.constant 0 : i32
      %286 = tpu.memref_slice %arg3[%c0_i32_224, %c0_i32_225] : memref<64x128xf32, #tpu.memory_space<any>> -> memref<1x128xf32, #tpu.memory_space<any>>
      %c9_i32_226 = arith.constant 9 : i32
      %c0_i32_227 = arith.constant 0 : i32
      %287 = tpu.memref_slice %arg7[%c9_i32_226, %c0_i32_227] : memref<32x128xf32, #tpu.memory_space<vmem>> -> memref<1x128xf32, #tpu.memory_space<vmem>>
      %288 = tpu.memref_slice %arg9[%c9_i32_223] : memref<32x!tpu.dma_semaphore, #tpu.memory_space<semaphore_mem>> -> memref<1x!tpu.dma_semaphore, #tpu.memory_space<semaphore_mem>>
      %289 = tpu.memref_squeeze %288 : memref<1x!tpu.dma_semaphore, #tpu.memory_space<semaphore_mem>> -> memref<!tpu.dma_semaphore, #tpu.memory_space<semaphore_mem>>
      tpu.wait_dma2 semaphore(%289 : memref<!tpu.dma_semaphore, #tpu.memory_space<semaphore_mem>>) src(%286 : memref<1x128xf32, #tpu.memory_space<any>>) dst(%287 : memref<1x128xf32, #tpu.memory_space<vmem>>)
      %c17_i32_228 = arith.constant 17 : i32
      %c0_i32_229 = arith.constant 0 : i32
      %c0_i32_230 = arith.constant 0 : i32
      %290 = tpu.memref_slice %arg3[%c0_i32_229, %c0_i32_230] : memref<64x128xf32, #tpu.memory_space<any>> -> memref<1x128xf32, #tpu.memory_space<any>>
      %c17_i32_231 = arith.constant 17 : i32
      %c0_i32_232 = arith.constant 0 : i32
      %291 = tpu.memref_slice %arg7[%c17_i32_231, %c0_i32_232] : memref<32x128xf32, #tpu.memory_space<vmem>> -> memref<1x128xf32, #tpu.memory_space<vmem>>
      %292 = tpu.memref_slice %arg9[%c17_i32_228] : memref<32x!tpu.dma_semaphore, #tpu.memory_space<semaphore_mem>> -> memref<1x!tpu.dma_semaphore, #tpu.memory_space<semaphore_mem>>
      %293 = tpu.memref_squeeze %292 : memref<1x!tpu.dma_semaphore, #tpu.memory_space<semaphore_mem>> -> memref<!tpu.dma_semaphore, #tpu.memory_space<semaphore_mem>>
      tpu.wait_dma2 semaphore(%293 : memref<!tpu.dma_semaphore, #tpu.memory_space<semaphore_mem>>) src(%290 : memref<1x128xf32, #tpu.memory_space<any>>) dst(%291 : memref<1x128xf32, #tpu.memory_space<vmem>>)
      %c25_i32_233 = arith.constant 25 : i32
      %c0_i32_234 = arith.constant 0 : i32
      %c0_i32_235 = arith.constant 0 : i32
      %294 = tpu.memref_slice %arg3[%c0_i32_234, %c0_i32_235] : memref<64x128xf32, #tpu.memory_space<any>> -> memref<1x128xf32, #tpu.memory_space<any>>
      %c25_i32_236 = arith.constant 25 : i32
      %c0_i32_237 = arith.constant 0 : i32
      %295 = tpu.memref_slice %arg7[%c25_i32_236, %c0_i32_237] : memref<32x128xf32, #tpu.memory_space<vmem>> -> memref<1x128xf32, #tpu.memory_space<vmem>>
      %296 = tpu.memref_slice %arg9[%c25_i32_233] : memref<32x!tpu.dma_semaphore, #tpu.memory_space<semaphore_mem>> -> memref<1x!tpu.dma_semaphore, #tpu.memory_space<semaphore_mem>>
      %297 = tpu.memref_squeeze %296 : memref<1x!tpu.dma_semaphore, #tpu.memory_space<semaphore_mem>> -> memref<!tpu.dma_semaphore, #tpu.memory_space<semaphore_mem>>
      tpu.wait_dma2 semaphore(%297 : memref<!tpu.dma_semaphore, #tpu.memory_space<semaphore_mem>>) src(%294 : memref<1x128xf32, #tpu.memory_space<any>>) dst(%295 : memref<1x128xf32, #tpu.memory_space<vmem>>)
      %c2_i32_238 = arith.constant 2 : i32
      %c0_i32_239 = arith.constant 0 : i32
      %c0_i32_240 = arith.constant 0 : i32
      %298 = tpu.memref_slice %arg3[%c0_i32_239, %c0_i32_240] : memref<64x128xf32, #tpu.memory_space<any>> -> memref<1x128xf32, #tpu.memory_space<any>>
      %c2_i32_241 = arith.constant 2 : i32
      %c0_i32_242 = arith.constant 0 : i32
      %299 = tpu.memref_slice %arg7[%c2_i32_241, %c0_i32_242] : memref<32x128xf32, #tpu.memory_space<vmem>> -> memref<1x128xf32, #tpu.memory_space<vmem>>
      %300 = tpu.memref_slice %arg9[%c2_i32_238] : memref<32x!tpu.dma_semaphore, #tpu.memory_space<semaphore_mem>> -> memref<1x!tpu.dma_semaphore, #tpu.memory_space<semaphore_mem>>
      %301 = tpu.memref_squeeze %300 : memref<1x!tpu.dma_semaphore, #tpu.memory_space<semaphore_mem>> -> memref<!tpu.dma_semaphore, #tpu.memory_space<semaphore_mem>>
      tpu.wait_dma2 semaphore(%301 : memref<!tpu.dma_semaphore, #tpu.memory_space<semaphore_mem>>) src(%298 : memref<1x128xf32, #tpu.memory_space<any>>) dst(%299 : memref<1x128xf32, #tpu.memory_space<vmem>>)
      %c10_i32_243 = arith.constant 10 : i32
      %c0_i32_244 = arith.constant 0 : i32
      %c0_i32_245 = arith.constant 0 : i32
      %302 = tpu.memref_slice %arg3[%c0_i32_244, %c0_i32_245] : memref<64x128xf32, #tpu.memory_space<any>> -> memref<1x128xf32, #tpu.memory_space<any>>
      %c10_i32_246 = arith.constant 10 : i32
      %c0_i32_247 = arith.constant 0 : i32
      %303 = tpu.memref_slice %arg7[%c10_i32_246, %c0_i32_247] : memref<32x128xf32, #tpu.memory_space<vmem>> -> memref<1x128xf32, #tpu.memory_space<vmem>>
      %304 = tpu.memref_slice %arg9[%c10_i32_243] : memref<32x!tpu.dma_semaphore, #tpu.memory_space<semaphore_mem>> -> memref<1x!tpu.dma_semaphore, #tpu.memory_space<semaphore_mem>>
      %305 = tpu.memref_squeeze %304 : memref<1x!tpu.dma_semaphore, #tpu.memory_space<semaphore_mem>> -> memref<!tpu.dma_semaphore, #tpu.memory_space<semaphore_mem>>
      tpu.wait_dma2 semaphore(%305 : memref<!tpu.dma_semaphore, #tpu.memory_space<semaphore_mem>>) src(%302 : memref<1x128xf32, #tpu.memory_space<any>>) dst(%303 : memref<1x128xf32, #tpu.memory_space<vmem>>)
      %c18_i32_248 = arith.constant 18 : i32
      %c0_i32_249 = arith.constant 0 : i32
      %c0_i32_250 = arith.constant 0 : i32
      %306 = tpu.memref_slice %arg3[%c0_i32_249, %c0_i32_250] : memref<64x128xf32, #tpu.memory_space<any>> -> memref<1x128xf32, #tpu.memory_space<any>>
      %c18_i32_251 = arith.constant 18 : i32
      %c0_i32_252 = arith.constant 0 : i32
      %307 = tpu.memref_slice %arg7[%c18_i32_251, %c0_i32_252] : memref<32x128xf32, #tpu.memory_space<vmem>> -> memref<1x128xf32, #tpu.memory_space<vmem>>
      %308 = tpu.memref_slice %arg9[%c18_i32_248] : memref<32x!tpu.dma_semaphore, #tpu.memory_space<semaphore_mem>> -> memref<1x!tpu.dma_semaphore, #tpu.memory_space<semaphore_mem>>
      %309 = tpu.memref_squeeze %308 : memref<1x!tpu.dma_semaphore, #tpu.memory_space<semaphore_mem>> -> memref<!tpu.dma_semaphore, #tpu.memory_space<semaphore_mem>>
      tpu.wait_dma2 semaphore(%309 : memref<!tpu.dma_semaphore, #tpu.memory_space<semaphore_mem>>) src(%306 : memref<1x128xf32, #tpu.memory_space<any>>) dst(%307 : memref<1x128xf32, #tpu.memory_space<vmem>>)
      %c26_i32_253 = arith.constant 26 : i32
      %c0_i32_254 = arith.constant 0 : i32
      %c0_i32_255 = arith.constant 0 : i32
      %310 = tpu.memref_slice %arg3[%c0_i32_254, %c0_i32_255] : memref<64x128xf32, #tpu.memory_space<any>> -> memref<1x128xf32, #tpu.memory_space<any>>
      %c26_i32_256 = arith.constant 26 : i32
      %c0_i32_257 = arith.constant 0 : i32
      %311 = tpu.memref_slice %arg7[%c26_i32_256, %c0_i32_257] : memref<32x128xf32, #tpu.memory_space<vmem>> -> memref<1x128xf32, #tpu.memory_space<vmem>>
      %312 = tpu.memref_slice %arg9[%c26_i32_253] : memref<32x!tpu.dma_semaphore, #tpu.memory_space<semaphore_mem>> -> memref<1x!tpu.dma_semaphore, #tpu.memory_space<semaphore_mem>>
      %313 = tpu.memref_squeeze %312 : memref<1x!tpu.dma_semaphore, #tpu.memory_space<semaphore_mem>> -> memref<!tpu.dma_semaphore, #tpu.memory_space<semaphore_mem>>
      tpu.wait_dma2 semaphore(%313 : memref<!tpu.dma_semaphore, #tpu.memory_space<semaphore_mem>>) src(%310 : memref<1x128xf32, #tpu.memory_space<any>>) dst(%311 : memref<1x128xf32, #tpu.memory_space<vmem>>)
      %c3_i32_258 = arith.constant 3 : i32
      %c0_i32_259 = arith.constant 0 : i32
      %c0_i32_260 = arith.constant 0 : i32
      %314 = tpu.memref_slice %arg3[%c0_i32_259, %c0_i32_260] : memref<64x128xf32, #tpu.memory_space<any>> -> memref<1x128xf32, #tpu.memory_space<any>>
      %c3_i32_261 = arith.constant 3 : i32
      %c0_i32_262 = arith.constant 0 : i32
      %315 = tpu.memref_slice %arg7[%c3_i32_261, %c0_i32_262] : memref<32x128xf32, #tpu.memory_space<vmem>> -> memref<1x128xf32, #tpu.memory_space<vmem>>
      %316 = tpu.memref_slice %arg9[%c3_i32_258] : memref<32x!tpu.dma_semaphore, #tpu.memory_space<semaphore_mem>> -> memref<1x!tpu.dma_semaphore, #tpu.memory_space<semaphore_mem>>
      %317 = tpu.memref_squeeze %316 : memref<1x!tpu.dma_semaphore, #tpu.memory_space<semaphore_mem>> -> memref<!tpu.dma_semaphore, #tpu.memory_space<semaphore_mem>>
      tpu.wait_dma2 semaphore(%317 : memref<!tpu.dma_semaphore, #tpu.memory_space<semaphore_mem>>) src(%314 : memref<1x128xf32, #tpu.memory_space<any>>) dst(%315 : memref<1x128xf32, #tpu.memory_space<vmem>>)
      %c11_i32_263 = arith.constant 11 : i32
      %c0_i32_264 = arith.constant 0 : i32
      %c0_i32_265 = arith.constant 0 : i32
      %318 = tpu.memref_slice %arg3[%c0_i32_264, %c0_i32_265] : memref<64x128xf32, #tpu.memory_space<any>> -> memref<1x128xf32, #tpu.memory_space<any>>
      %c11_i32_266 = arith.constant 11 : i32
      %c0_i32_267 = arith.constant 0 : i32
      %319 = tpu.memref_slice %arg7[%c11_i32_266, %c0_i32_267] : memref<32x128xf32, #tpu.memory_space<vmem>> -> memref<1x128xf32, #tpu.memory_space<vmem>>
      %320 = tpu.memref_slice %arg9[%c11_i32_263] : memref<32x!tpu.dma_semaphore, #tpu.memory_space<semaphore_mem>> -> memref<1x!tpu.dma_semaphore, #tpu.memory_space<semaphore_mem>>
      %321 = tpu.memref_squeeze %320 : memref<1x!tpu.dma_semaphore, #tpu.memory_space<semaphore_mem>> -> memref<!tpu.dma_semaphore, #tpu.memory_space<semaphore_mem>>
      tpu.wait_dma2 semaphore(%321 : memref<!tpu.dma_semaphore, #tpu.memory_space<semaphore_mem>>) src(%318 : memref<1x128xf32, #tpu.memory_space<any>>) dst(%319 : memref<1x128xf32, #tpu.memory_space<vmem>>)
      %c19_i32_268 = arith.constant 19 : i32
      %c0_i32_269 = arith.constant 0 : i32
      %c0_i32_270 = arith.constant 0 : i32
      %322 = tpu.memref_slice %arg3[%c0_i32_269, %c0_i32_270] : memref<64x128xf32, #tpu.memory_space<any>> -> memref<1x128xf32, #tpu.memory_space<any>>
      %c19_i32_271 = arith.constant 19 : i32
      %c0_i32_272 = arith.constant 0 : i32
      %323 = tpu.memref_slice %arg7[%c19_i32_271, %c0_i32_272] : memref<32x128xf32, #tpu.memory_space<vmem>> -> memref<1x128xf32, #tpu.memory_space<vmem>>
      %324 = tpu.memref_slice %arg9[%c19_i32_268] : memref<32x!tpu.dma_semaphore, #tpu.memory_space<semaphore_mem>> -> memref<1x!tpu.dma_semaphore, #tpu.memory_space<semaphore_mem>>
      %325 = tpu.memref_squeeze %324 : memref<1x!tpu.dma_semaphore, #tpu.memory_space<semaphore_mem>> -> memref<!tpu.dma_semaphore, #tpu.memory_space<semaphore_mem>>
      tpu.wait_dma2 semaphore(%325 : memref<!tpu.dma_semaphore, #tpu.memory_space<semaphore_mem>>) src(%322 : memref<1x128xf32, #tpu.memory_space<any>>) dst(%323 : memref<1x128xf32, #tpu.memory_space<vmem>>)
      %c27_i32_273 = arith.constant 27 : i32
      %c0_i32_274 = arith.constant 0 : i32
      %c0_i32_275 = arith.constant 0 : i32
      %326 = tpu.memref_slice %arg3[%c0_i32_274, %c0_i32_275] : memref<64x128xf32, #tpu.memory_space<any>> -> memref<1x128xf32, #tpu.memory_space<any>>
      %c27_i32_276 = arith.constant 27 : i32
      %c0_i32_277 = arith.constant 0 : i32
      %327 = tpu.memref_slice %arg7[%c27_i32_276, %c0_i32_277] : memref<32x128xf32, #tpu.memory_space<vmem>> -> memref<1x128xf32, #tpu.memory_space<vmem>>
      %328 = tpu.memref_slice %arg9[%c27_i32_273] : memref<32x!tpu.dma_semaphore, #tpu.memory_space<semaphore_mem>> -> memref<1x!tpu.dma_semaphore, #tpu.memory_space<semaphore_mem>>
      %329 = tpu.memref_squeeze %328 : memref<1x!tpu.dma_semaphore, #tpu.memory_space<semaphore_mem>> -> memref<!tpu.dma_semaphore, #tpu.memory_space<semaphore_mem>>
      tpu.wait_dma2 semaphore(%329 : memref<!tpu.dma_semaphore, #tpu.memory_space<semaphore_mem>>) src(%326 : memref<1x128xf32, #tpu.memory_space<any>>) dst(%327 : memref<1x128xf32, #tpu.memory_space<vmem>>)
      %c4_i32_278 = arith.constant 4 : i32
      %c0_i32_279 = arith.constant 0 : i32
      %c0_i32_280 = arith.constant 0 : i32
      %330 = tpu.memref_slice %arg3[%c0_i32_279, %c0_i32_280] : memref<64x128xf32, #tpu.memory_space<any>> -> memref<1x128xf32, #tpu.memory_space<any>>
      %c4_i32_281 = arith.constant 4 : i32
      %c0_i32_282 = arith.constant 0 : i32
      %331 = tpu.memref_slice %arg7[%c4_i32_281, %c0_i32_282] : memref<32x128xf32, #tpu.memory_space<vmem>> -> memref<1x128xf32, #tpu.memory_space<vmem>>
      %332 = tpu.memref_slice %arg9[%c4_i32_278] : memref<32x!tpu.dma_semaphore, #tpu.memory_space<semaphore_mem>> -> memref<1x!tpu.dma_semaphore, #tpu.memory_space<semaphore_mem>>
      %333 = tpu.memref_squeeze %332 : memref<1x!tpu.dma_semaphore, #tpu.memory_space<semaphore_mem>> -> memref<!tpu.dma_semaphore, #tpu.memory_space<semaphore_mem>>
      tpu.wait_dma2 semaphore(%333 : memref<!tpu.dma_semaphore, #tpu.memory_space<semaphore_mem>>) src(%330 : memref<1x128xf32, #tpu.memory_space<any>>) dst(%331 : memref<1x128xf32, #tpu.memory_space<vmem>>)
      %c12_i32_283 = arith.constant 12 : i32
      %c0_i32_284 = arith.constant 0 : i32
      %c0_i32_285 = arith.constant 0 : i32
      %334 = tpu.memref_slice %arg3[%c0_i32_284, %c0_i32_285] : memref<64x128xf32, #tpu.memory_space<any>> -> memref<1x128xf32, #tpu.memory_space<any>>
      %c12_i32_286 = arith.constant 12 : i32
      %c0_i32_287 = arith.constant 0 : i32
      %335 = tpu.memref_slice %arg7[%c12_i32_286, %c0_i32_287] : memref<32x128xf32, #tpu.memory_space<vmem>> -> memref<1x128xf32, #tpu.memory_space<vmem>>
      %336 = tpu.memref_slice %arg9[%c12_i32_283] : memref<32x!tpu.dma_semaphore, #tpu.memory_space<semaphore_mem>> -> memref<1x!tpu.dma_semaphore, #tpu.memory_space<semaphore_mem>>
      %337 = tpu.memref_squeeze %336 : memref<1x!tpu.dma_semaphore, #tpu.memory_space<semaphore_mem>> -> memref<!tpu.dma_semaphore, #tpu.memory_space<semaphore_mem>>
      tpu.wait_dma2 semaphore(%337 : memref<!tpu.dma_semaphore, #tpu.memory_space<semaphore_mem>>) src(%334 : memref<1x128xf32, #tpu.memory_space<any>>) dst(%335 : memref<1x128xf32, #tpu.memory_space<vmem>>)
      %c20_i32_288 = arith.constant 20 : i32
      %c0_i32_289 = arith.constant 0 : i32
      %c0_i32_290 = arith.constant 0 : i32
      %338 = tpu.memref_slice %arg3[%c0_i32_289, %c0_i32_290] : memref<64x128xf32, #tpu.memory_space<any>> -> memref<1x128xf32, #tpu.memory_space<any>>
      %c20_i32_291 = arith.constant 20 : i32
      %c0_i32_292 = arith.constant 0 : i32
      %339 = tpu.memref_slice %arg7[%c20_i32_291, %c0_i32_292] : memref<32x128xf32, #tpu.memory_space<vmem>> -> memref<1x128xf32, #tpu.memory_space<vmem>>
      %340 = tpu.memref_slice %arg9[%c20_i32_288] : memref<32x!tpu.dma_semaphore, #tpu.memory_space<semaphore_mem>> -> memref<1x!tpu.dma_semaphore, #tpu.memory_space<semaphore_mem>>
      %341 = tpu.memref_squeeze %340 : memref<1x!tpu.dma_semaphore, #tpu.memory_space<semaphore_mem>> -> memref<!tpu.dma_semaphore, #tpu.memory_space<semaphore_mem>>
      tpu.wait_dma2 semaphore(%341 : memref<!tpu.dma_semaphore, #tpu.memory_space<semaphore_mem>>) src(%338 : memref<1x128xf32, #tpu.memory_space<any>>) dst(%339 : memref<1x128xf32, #tpu.memory_space<vmem>>)
      %c28_i32_293 = arith.constant 28 : i32
      %c0_i32_294 = arith.constant 0 : i32
      %c0_i32_295 = arith.constant 0 : i32
      %342 = tpu.memref_slice %arg3[%c0_i32_294, %c0_i32_295] : memref<64x128xf32, #tpu.memory_space<any>> -> memref<1x128xf32, #tpu.memory_space<any>>
      %c28_i32_296 = arith.constant 28 : i32
      %c0_i32_297 = arith.constant 0 : i32
      %343 = tpu.memref_slice %arg7[%c28_i32_296, %c0_i32_297] : memref<32x128xf32, #tpu.memory_space<vmem>> -> memref<1x128xf32, #tpu.memory_space<vmem>>
      %344 = tpu.memref_slice %arg9[%c28_i32_293] : memref<32x!tpu.dma_semaphore, #tpu.memory_space<semaphore_mem>> -> memref<1x!tpu.dma_semaphore, #tpu.memory_space<semaphore_mem>>
      %345 = tpu.memref_squeeze %344 : memref<1x!tpu.dma_semaphore, #tpu.memory_space<semaphore_mem>> -> memref<!tpu.dma_semaphore, #tpu.memory_space<semaphore_mem>>
      tpu.wait_dma2 semaphore(%345 : memref<!tpu.dma_semaphore, #tpu.memory_space<semaphore_mem>>) src(%342 : memref<1x128xf32, #tpu.memory_space<any>>) dst(%343 : memref<1x128xf32, #tpu.memory_space<vmem>>)
      %c5_i32_298 = arith.constant 5 : i32
      %c0_i32_299 = arith.constant 0 : i32
      %c0_i32_300 = arith.constant 0 : i32
      %346 = tpu.memref_slice %arg3[%c0_i32_299, %c0_i32_300] : memref<64x128xf32, #tpu.memory_space<any>> -> memref<1x128xf32, #tpu.memory_space<any>>
      %c5_i32_301 = arith.constant 5 : i32
      %c0_i32_302 = arith.constant 0 : i32
      %347 = tpu.memref_slice %arg7[%c5_i32_301, %c0_i32_302] : memref<32x128xf32, #tpu.memory_space<vmem>> -> memref<1x128xf32, #tpu.memory_space<vmem>>
      %348 = tpu.memref_slice %arg9[%c5_i32_298] : memref<32x!tpu.dma_semaphore, #tpu.memory_space<semaphore_mem>> -> memref<1x!tpu.dma_semaphore, #tpu.memory_space<semaphore_mem>>
      %349 = tpu.memref_squeeze %348 : memref<1x!tpu.dma_semaphore, #tpu.memory_space<semaphore_mem>> -> memref<!tpu.dma_semaphore, #tpu.memory_space<semaphore_mem>>
      tpu.wait_dma2 semaphore(%349 : memref<!tpu.dma_semaphore, #tpu.memory_space<semaphore_mem>>) src(%346 : memref<1x128xf32, #tpu.memory_space<any>>) dst(%347 : memref<1x128xf32, #tpu.memory_space<vmem>>)
      %c13_i32_303 = arith.constant 13 : i32
      %c0_i32_304 = arith.constant 0 : i32
      %c0_i32_305 = arith.constant 0 : i32
      %350 = tpu.memref_slice %arg3[%c0_i32_304, %c0_i32_305] : memref<64x128xf32, #tpu.memory_space<any>> -> memref<1x128xf32, #tpu.memory_space<any>>
      %c13_i32_306 = arith.constant 13 : i32
      %c0_i32_307 = arith.constant 0 : i32
      %351 = tpu.memref_slice %arg7[%c13_i32_306, %c0_i32_307] : memref<32x128xf32, #tpu.memory_space<vmem>> -> memref<1x128xf32, #tpu.memory_space<vmem>>
      %352 = tpu.memref_slice %arg9[%c13_i32_303] : memref<32x!tpu.dma_semaphore, #tpu.memory_space<semaphore_mem>> -> memref<1x!tpu.dma_semaphore, #tpu.memory_space<semaphore_mem>>
      %353 = tpu.memref_squeeze %352 : memref<1x!tpu.dma_semaphore, #tpu.memory_space<semaphore_mem>> -> memref<!tpu.dma_semaphore, #tpu.memory_space<semaphore_mem>>
      tpu.wait_dma2 semaphore(%353 : memref<!tpu.dma_semaphore, #tpu.memory_space<semaphore_mem>>) src(%350 : memref<1x128xf32, #tpu.memory_space<any>>) dst(%351 : memref<1x128xf32, #tpu.memory_space<vmem>>)
      %c21_i32_308 = arith.constant 21 : i32
      %c0_i32_309 = arith.constant 0 : i32
      %c0_i32_310 = arith.constant 0 : i32
      %354 = tpu.memref_slice %arg3[%c0_i32_309, %c0_i32_310] : memref<64x128xf32, #tpu.memory_space<any>> -> memref<1x128xf32, #tpu.memory_space<any>>
      %c21_i32_311 = arith.constant 21 : i32
      %c0_i32_312 = arith.constant 0 : i32
      %355 = tpu.memref_slice %arg7[%c21_i32_311, %c0_i32_312] : memref<32x128xf32, #tpu.memory_space<vmem>> -> memref<1x128xf32, #tpu.memory_space<vmem>>
      %356 = tpu.memref_slice %arg9[%c21_i32_308] : memref<32x!tpu.dma_semaphore, #tpu.memory_space<semaphore_mem>> -> memref<1x!tpu.dma_semaphore, #tpu.memory_space<semaphore_mem>>
      %357 = tpu.memref_squeeze %356 : memref<1x!tpu.dma_semaphore, #tpu.memory_space<semaphore_mem>> -> memref<!tpu.dma_semaphore, #tpu.memory_space<semaphore_mem>>
      tpu.wait_dma2 semaphore(%357 : memref<!tpu.dma_semaphore, #tpu.memory_space<semaphore_mem>>) src(%354 : memref<1x128xf32, #tpu.memory_space<any>>) dst(%355 : memref<1x128xf32, #tpu.memory_space<vmem>>)
      %c29_i32_313 = arith.constant 29 : i32
      %c0_i32_314 = arith.constant 0 : i32
      %c0_i32_315 = arith.constant 0 : i32
      %358 = tpu.memref_slice %arg3[%c0_i32_314, %c0_i32_315] : memref<64x128xf32, #tpu.memory_space<any>> -> memref<1x128xf32, #tpu.memory_space<any>>
      %c29_i32_316 = arith.constant 29 : i32
      %c0_i32_317 = arith.constant 0 : i32
      %359 = tpu.memref_slice %arg7[%c29_i32_316, %c0_i32_317] : memref<32x128xf32, #tpu.memory_space<vmem>> -> memref<1x128xf32, #tpu.memory_space<vmem>>
      %360 = tpu.memref_slice %arg9[%c29_i32_313] : memref<32x!tpu.dma_semaphore, #tpu.memory_space<semaphore_mem>> -> memref<1x!tpu.dma_semaphore, #tpu.memory_space<semaphore_mem>>
      %361 = tpu.memref_squeeze %360 : memref<1x!tpu.dma_semaphore, #tpu.memory_space<semaphore_mem>> -> memref<!tpu.dma_semaphore, #tpu.memory_space<semaphore_mem>>
      tpu.wait_dma2 semaphore(%361 : memref<!tpu.dma_semaphore, #tpu.memory_space<semaphore_mem>>) src(%358 : memref<1x128xf32, #tpu.memory_space<any>>) dst(%359 : memref<1x128xf32, #tpu.memory_space<vmem>>)
      %c6_i32_318 = arith.constant 6 : i32
      %c0_i32_319 = arith.constant 0 : i32
      %c0_i32_320 = arith.constant 0 : i32
      %362 = tpu.memref_slice %arg3[%c0_i32_319, %c0_i32_320] : memref<64x128xf32, #tpu.memory_space<any>> -> memref<1x128xf32, #tpu.memory_space<any>>
      %c6_i32_321 = arith.constant 6 : i32
      %c0_i32_322 = arith.constant 0 : i32
      %363 = tpu.memref_slice %arg7[%c6_i32_321, %c0_i32_322] : memref<32x128xf32, #tpu.memory_space<vmem>> -> memref<1x128xf32, #tpu.memory_space<vmem>>
      %364 = tpu.memref_slice %arg9[%c6_i32_318] : memref<32x!tpu.dma_semaphore, #tpu.memory_space<semaphore_mem>> -> memref<1x!tpu.dma_semaphore, #tpu.memory_space<semaphore_mem>>
      %365 = tpu.memref_squeeze %364 : memref<1x!tpu.dma_semaphore, #tpu.memory_space<semaphore_mem>> -> memref<!tpu.dma_semaphore, #tpu.memory_space<semaphore_mem>>
      tpu.wait_dma2 semaphore(%365 : memref<!tpu.dma_semaphore, #tpu.memory_space<semaphore_mem>>) src(%362 : memref<1x128xf32, #tpu.memory_space<any>>) dst(%363 : memref<1x128xf32, #tpu.memory_space<vmem>>)
      %c14_i32_323 = arith.constant 14 : i32
      %c0_i32_324 = arith.constant 0 : i32
      %c0_i32_325 = arith.constant 0 : i32
      %366 = tpu.memref_slice %arg3[%c0_i32_324, %c0_i32_325] : memref<64x128xf32, #tpu.memory_space<any>> -> memref<1x128xf32, #tpu.memory_space<any>>
      %c14_i32_326 = arith.constant 14 : i32
      %c0_i32_327 = arith.constant 0 : i32
      %367 = tpu.memref_slice %arg7[%c14_i32_326, %c0_i32_327] : memref<32x128xf32, #tpu.memory_space<vmem>> -> memref<1x128xf32, #tpu.memory_space<vmem>>
      %368 = tpu.memref_slice %arg9[%c14_i32_323] : memref<32x!tpu.dma_semaphore, #tpu.memory_space<semaphore_mem>> -> memref<1x!tpu.dma_semaphore, #tpu.memory_space<semaphore_mem>>
      %369 = tpu.memref_squeeze %368 : memref<1x!tpu.dma_semaphore, #tpu.memory_space<semaphore_mem>> -> memref<!tpu.dma_semaphore, #tpu.memory_space<semaphore_mem>>
      tpu.wait_dma2 semaphore(%369 : memref<!tpu.dma_semaphore, #tpu.memory_space<semaphore_mem>>) src(%366 : memref<1x128xf32, #tpu.memory_space<any>>) dst(%367 : memref<1x128xf32, #tpu.memory_space<vmem>>)
      %c22_i32_328 = arith.constant 22 : i32
      %c0_i32_329 = arith.constant 0 : i32
      %c0_i32_330 = arith.constant 0 : i32
      %370 = tpu.memref_slice %arg3[%c0_i32_329, %c0_i32_330] : memref<64x128xf32, #tpu.memory_space<any>> -> memref<1x128xf32, #tpu.memory_space<any>>
      %c22_i32_331 = arith.constant 22 : i32
      %c0_i32_332 = arith.constant 0 : i32
      %371 = tpu.memref_slice %arg7[%c22_i32_331, %c0_i32_332] : memref<32x128xf32, #tpu.memory_space<vmem>> -> memref<1x128xf32, #tpu.memory_space<vmem>>
      %372 = tpu.memref_slice %arg9[%c22_i32_328] : memref<32x!tpu.dma_semaphore, #tpu.memory_space<semaphore_mem>> -> memref<1x!tpu.dma_semaphore, #tpu.memory_space<semaphore_mem>>
      %373 = tpu.memref_squeeze %372 : memref<1x!tpu.dma_semaphore, #tpu.memory_space<semaphore_mem>> -> memref<!tpu.dma_semaphore, #tpu.memory_space<semaphore_mem>>
      tpu.wait_dma2 semaphore(%373 : memref<!tpu.dma_semaphore, #tpu.memory_space<semaphore_mem>>) src(%370 : memref<1x128xf32, #tpu.memory_space<any>>) dst(%371 : memref<1x128xf32, #tpu.memory_space<vmem>>)
      %c30_i32_333 = arith.constant 30 : i32
      %c0_i32_334 = arith.constant 0 : i32
      %c0_i32_335 = arith.constant 0 : i32
      %374 = tpu.memref_slice %arg3[%c0_i32_334, %c0_i32_335] : memref<64x128xf32, #tpu.memory_space<any>> -> memref<1x128xf32, #tpu.memory_space<any>>
      %c30_i32_336 = arith.constant 30 : i32
      %c0_i32_337 = arith.constant 0 : i32
      %375 = tpu.memref_slice %arg7[%c30_i32_336, %c0_i32_337] : memref<32x128xf32, #tpu.memory_space<vmem>> -> memref<1x128xf32, #tpu.memory_space<vmem>>
      %376 = tpu.memref_slice %arg9[%c30_i32_333] : memref<32x!tpu.dma_semaphore, #tpu.memory_space<semaphore_mem>> -> memref<1x!tpu.dma_semaphore, #tpu.memory_space<semaphore_mem>>
      %377 = tpu.memref_squeeze %376 : memref<1x!tpu.dma_semaphore, #tpu.memory_space<semaphore_mem>> -> memref<!tpu.dma_semaphore, #tpu.memory_space<semaphore_mem>>
      tpu.wait_dma2 semaphore(%377 : memref<!tpu.dma_semaphore, #tpu.memory_space<semaphore_mem>>) src(%374 : memref<1x128xf32, #tpu.memory_space<any>>) dst(%375 : memref<1x128xf32, #tpu.memory_space<vmem>>)
      %c7_i32_338 = arith.constant 7 : i32
      %c0_i32_339 = arith.constant 0 : i32
      %c0_i32_340 = arith.constant 0 : i32
      %378 = tpu.memref_slice %arg3[%c0_i32_339, %c0_i32_340] : memref<64x128xf32, #tpu.memory_space<any>> -> memref<1x128xf32, #tpu.memory_space<any>>
      %c7_i32_341 = arith.constant 7 : i32
      %c0_i32_342 = arith.constant 0 : i32
      %379 = tpu.memref_slice %arg7[%c7_i32_341, %c0_i32_342] : memref<32x128xf32, #tpu.memory_space<vmem>> -> memref<1x128xf32, #tpu.memory_space<vmem>>
      %380 = tpu.memref_slice %arg9[%c7_i32_338] : memref<32x!tpu.dma_semaphore, #tpu.memory_space<semaphore_mem>> -> memref<1x!tpu.dma_semaphore, #tpu.memory_space<semaphore_mem>>
      %381 = tpu.memref_squeeze %380 : memref<1x!tpu.dma_semaphore, #tpu.memory_space<semaphore_mem>> -> memref<!tpu.dma_semaphore, #tpu.memory_space<semaphore_mem>>
      tpu.wait_dma2 semaphore(%381 : memref<!tpu.dma_semaphore, #tpu.memory_space<semaphore_mem>>) src(%378 : memref<1x128xf32, #tpu.memory_space<any>>) dst(%379 : memref<1x128xf32, #tpu.memory_space<vmem>>)
      %c15_i32_343 = arith.constant 15 : i32
      %c0_i32_344 = arith.constant 0 : i32
      %c0_i32_345 = arith.constant 0 : i32
      %382 = tpu.memref_slice %arg3[%c0_i32_344, %c0_i32_345] : memref<64x128xf32, #tpu.memory_space<any>> -> memref<1x128xf32, #tpu.memory_space<any>>
      %c15_i32_346 = arith.constant 15 : i32
      %c0_i32_347 = arith.constant 0 : i32
      %383 = tpu.memref_slice %arg7[%c15_i32_346, %c0_i32_347] : memref<32x128xf32, #tpu.memory_space<vmem>> -> memref<1x128xf32, #tpu.memory_space<vmem>>
      %384 = tpu.memref_slice %arg9[%c15_i32_343] : memref<32x!tpu.dma_semaphore, #tpu.memory_space<semaphore_mem>> -> memref<1x!tpu.dma_semaphore, #tpu.memory_space<semaphore_mem>>
      %385 = tpu.memref_squeeze %384 : memref<1x!tpu.dma_semaphore, #tpu.memory_space<semaphore_mem>> -> memref<!tpu.dma_semaphore, #tpu.memory_space<semaphore_mem>>
      tpu.wait_dma2 semaphore(%385 : memref<!tpu.dma_semaphore, #tpu.memory_space<semaphore_mem>>) src(%382 : memref<1x128xf32, #tpu.memory_space<any>>) dst(%383 : memref<1x128xf32, #tpu.memory_space<vmem>>)
      %c23_i32_348 = arith.constant 23 : i32
      %c0_i32_349 = arith.constant 0 : i32
      %c0_i32_350 = arith.constant 0 : i32
      %386 = tpu.memref_slice %arg3[%c0_i32_349, %c0_i32_350] : memref<64x128xf32, #tpu.memory_space<any>> -> memref<1x128xf32, #tpu.memory_space<any>>
      %c23_i32_351 = arith.constant 23 : i32
      %c0_i32_352 = arith.constant 0 : i32
      %387 = tpu.memref_slice %arg7[%c23_i32_351, %c0_i32_352] : memref<32x128xf32, #tpu.memory_space<vmem>> -> memref<1x128xf32, #tpu.memory_space<vmem>>
      %388 = tpu.memref_slice %arg9[%c23_i32_348] : memref<32x!tpu.dma_semaphore, #tpu.memory_space<semaphore_mem>> -> memref<1x!tpu.dma_semaphore, #tpu.memory_space<semaphore_mem>>
      %389 = tpu.memref_squeeze %388 : memref<1x!tpu.dma_semaphore, #tpu.memory_space<semaphore_mem>> -> memref<!tpu.dma_semaphore, #tpu.memory_space<semaphore_mem>>
      tpu.wait_dma2 semaphore(%389 : memref<!tpu.dma_semaphore, #tpu.memory_space<semaphore_mem>>) src(%386 : memref<1x128xf32, #tpu.memory_space<any>>) dst(%387 : memref<1x128xf32, #tpu.memory_space<vmem>>)
      %c31_i32_353 = arith.constant 31 : i32
      %c0_i32_354 = arith.constant 0 : i32
      %c0_i32_355 = arith.constant 0 : i32
      %390 = tpu.memref_slice %arg3[%c0_i32_354, %c0_i32_355] : memref<64x128xf32, #tpu.memory_space<any>> -> memref<1x128xf32, #tpu.memory_space<any>>
      %c31_i32_356 = arith.constant 31 : i32
      %c0_i32_357 = arith.constant 0 : i32
      %391 = tpu.memref_slice %arg7[%c31_i32_356, %c0_i32_357] : memref<32x128xf32, #tpu.memory_space<vmem>> -> memref<1x128xf32, #tpu.memory_space<vmem>>
      %392 = tpu.memref_slice %arg9[%c31_i32_353] : memref<32x!tpu.dma_semaphore, #tpu.memory_space<semaphore_mem>> -> memref<1x!tpu.dma_semaphore, #tpu.memory_space<semaphore_mem>>
      %393 = tpu.memref_squeeze %392 : memref<1x!tpu.dma_semaphore, #tpu.memory_space<semaphore_mem>> -> memref<!tpu.dma_semaphore, #tpu.memory_space<semaphore_mem>>
      tpu.wait_dma2 semaphore(%393 : memref<!tpu.dma_semaphore, #tpu.memory_space<semaphore_mem>>) src(%390 : memref<1x128xf32, #tpu.memory_space<any>>) dst(%391 : memref<1x128xf32, #tpu.memory_space<vmem>>)
      %c0_358 = arith.constant 0 : index
      %c0_359 = arith.constant 0 : index
      %394 = vector.load %arg7[%c0_358, %c0_359] : memref<32x128xf32, #tpu.memory_space<vmem>>, vector<8x128xf32>
      %c8 = arith.constant 8 : index
      %c0_360 = arith.constant 0 : index
      %395 = vector.load %arg7[%c8, %c0_360] : memref<32x128xf32, #tpu.memory_space<vmem>>, vector<8x128xf32>
      %396 = arith.addf %394, %395 : vector<8x128xf32>
      %c16 = arith.constant 16 : index
      %c0_361 = arith.constant 0 : index
      %397 = vector.load %arg7[%c16, %c0_361] : memref<32x128xf32, #tpu.memory_space<vmem>>, vector<8x128xf32>
      %398 = arith.addf %396, %397 : vector<8x128xf32>
      %c24 = arith.constant 24 : index
      %c0_362 = arith.constant 0 : index
      %399 = vector.load %arg7[%c24, %c0_362] : memref<32x128xf32, #tpu.memory_space<vmem>>, vector<8x128xf32>
      %400 = arith.addf %398, %399 : vector<8x128xf32>
      %cst_363 = arith.constant 2.500000e-01 : f32
      %401 = vector.broadcast %cst_363 : f32 to vector<8x128xf32>
      %402 = arith.mulf %400, %401 : vector<8x128xf32>
      %c0_364 = arith.constant 0 : index
      %c0_365 = arith.constant 0 : index
      %403 = vector.load %arg8[%c0_364, %c0_365] : memref<8x128xf32, #tpu.memory_space<vmem>>, vector<8x128xf32>
      tpu.vector_store %arg8[%c0_364, %c0_365], %402 {strides = array<i32>} : memref<8x128xf32, #tpu.memory_space<vmem>>, vector<8x128xf32>,
    } else {
    }
    %c0 = arith.constant 0 : index
    %c0_1 = arith.constant 0 : index
    %3 = vector.load %arg8[%c0, %c0_1] : memref<8x128xf32, #tpu.memory_space<vmem>>, vector<8x128xf32>
    %c0_2 = arith.constant 0 : index
    %c0_3 = arith.constant 0 : index
    %4 = vector.load %arg4[%c0_2, %c0_3] : memref<128x128xf32, #tpu.memory_space<vmem>>, vector<128x128xf32>
    %cst = arith.constant dense<0.000000e+00> : vector<8x128xf32>
    %5 = tpu.matmul %3, %4, %cst {dimension_numbers = #tpu.dot_dimension_numbers<[1], [1], [0], [0], [0, 0, 1, 0], [], []>} : vector<8x128xf32>, vector<128x128xf32>, vector<8x128xf32> -> vector<8x128xf32>
    %c0_4 = arith.constant 0 : index
    %c0_5 = arith.constant 0 : index
    %6 = vector.load %arg5[%c0_4, %c0_5] : memref<1x128xf32, #tpu.memory_space<vmem>>, vector<1x128xf32>
    %7 = vector.broadcast %6 : vector<1x128xf32> to vector<8x128xf32>
    %8 = arith.addf %5, %7 : vector<8x128xf32>
    %c0_6 = arith.constant 0 : index
    %c0_7 = arith.constant 0 : index
    %9 = vector.load %arg6[%c0_6, %c0_7] : memref<8x128xf32, #tpu.memory_space<vmem>>, vector<8x128xf32>
    tpu.vector_store %arg6[%c0_6, %c0_7], %8 {strides = array<i32>} : memref<8x128xf32, #tpu.memory_space<vmem>>, vector<8x128xf32>,
    return
  }
  func.func @transform_1(%arg0: i32, %arg1: i32, %arg2: memref<8x4xi32, #tpu.memory_space<smem>>) -> (i32, i32) {
    %c0_i32 = arith.constant 0 : i32
    %c0_i32_0 = arith.constant 0 : i32
    return %arg1, %c0_i32 : i32, i32
  }
  func.func @transform_2(%arg0: i32, %arg1: i32, %arg2: memref<8x4xi32, #tpu.memory_space<smem>>) -> (i32, i32) {
    %c0_i32 = arith.constant 0 : i32
    %c0_i32_0 = arith.constant 0 : i32
    return %c0_i32, %arg1 : i32, i32
  }
  func.func @transform_3(%arg0: i32, %arg1: i32, %arg2: memref<8x4xi32, #tpu.memory_space<smem>>) -> (i32, i32) {
    %c0_i32 = arith.constant 0 : i32
    return %arg0, %arg1 : i32, i32
  }
}

</mosaic_0001>

<bundles_post_ra>
// kernel: cbow_forward.1
= control target key start
LH: loop header
LB: loop body
LE: loop exit
PB: predicated region body
PF: predicated region fallthrough
CT: control target
= control target key end

     0   :  { %s2826_s0 = inlined_call_operand.vmem [shape: s32[8,4], index: 0, kind: input, shape index: {}]   ;;  %s2827_s1 = inlined_call_operand.vmem [shape: f32[64,128], index: 1, kind: input, shape index: {}]   ;;  %s2828_s2 = inlined_call_operand.vmem [shape: f32[128,128], index: 2, kind: input, shape index: {}]   ;;  %s2829_s3 = inlined_call_operand.vmem [shape: f32[1,128], index: 3, kind: input, shape index: {}]   ;;  %s2830_s4 = inlined_call_operand.hbm [shape: f32[8,128], index: 4, kind: output, shape index: {}]  }
   0x1   :  { %s9_s17 = sshll.u32 %s2826_s0, 4  ;;  %s10_s17 = int_to_ptr.vmem [resolvable:$true] %s9_s17 }
   0x2   :  { %s2532_s18 = scalar_lea.vmem %s10_s17, 128  ;;  %p2537_p1 = scmp.lt.s32.totalorder %s10_s17, %s10_s17 }
   0x3   :  { %p2533_p0 = scmp.ne.s32.totalorder %s10_s17, %s2532_s18  ;;  %p2538_p2 = scmp.lt.s32.totalorder %s2532_s18, %s2532_s18 }
   0x5   :  { %p2539_p3 = por %p2538_p2, %p2537_p1 }
   0x7   :  { %p2540_p4 = pnand %p2539_p3, %p2533_p0 }
   0x9   :  { %2543 = shalt.err (!%p2540_p4)  }
   0xa   :  { %s2634_s19 = smov [#allocation6]  }
   0xb   :  { %12 = dma.vmem_to_smem %s10_s17, 128, %s2634_s19, [#allocation5] }
   0xc   :  { %2566 = dma.done.wait [#allocation5], 128 }
   0xd   :  { %2567 = vsyncadd [#allocation5], 4294967168 }
   0xe   :  { %14 = sfence }
   0xf   :  { %15 = vsyncpa [#allocation8], 0  ;;  %s26_s20 = sld [smem:[#allocation6]] }
  0x15   :  { %s27_s23 = scalar_lea.vmem %s2827_s1, %s26_s20 }
  0x16   :  { %v45_v0 = vld [vmem:[%s27_s23] sm:$0x1] }
  0x17   :  { %46 = vst [vmem:[#allocation2] sm:$0x1] %v45_v0 }
  0x18   :  { %71 = vsyncadd [#allocation4], 16  ;;  %s2387_s0 = sld [smem:[#allocation6 + $0x1]] }
  0x1e   :  { %s74_s26 = scalar_lea.vmem %s2827_s1, %s2387_s0 }
  0x1f   :  { %v94_v1 = vld [vmem:[%s74_s26] sm:$0x1] }
  0x20   :  { %95 = vst [vmem:[#allocation2 + $0x8] sm:$0x1] %v94_v1 }
  0x21   :  { %120 = vsyncadd [#allocation4 + $0x8], 16  ;;  %s2388_s27 = sld [smem:[#allocation6 + $0x2]] }
  0x27   :  { %s123_s30 = scalar_lea.vmem %s2827_s1, %s2388_s27 }
  0x28   :  { %v143_v2 = vld [vmem:[%s123_s30] sm:$0x1] }
  0x29   :  { %144 = vst [vmem:[#allocation2 + $0x10] sm:$0x1] %v143_v2 }
  0x2a   :  { %169 = vsyncadd [#allocation4 + $0x10], 16  ;;  %s2389_s5 = sld [smem:[#allocation6 + $0x3]] }
  0x30   :  { %s172_s8 = scalar_lea.vmem %s2827_s1, %s2389_s5 }
  0x31   :  { %v192_v3 = vld [vmem:[%s172_s8] sm:$0x1] }
  0x32   :  { %193 = vst [vmem:[#allocation2 + $0x18] sm:$0x1] %v192_v3 }
  0x33   :  { %218 = vsyncadd [#allocation4 + $0x18], 16  ;;  %s2390_s9 = sld [smem:[#allocation6 + $0x80]] }
  0x39   :  { %s222_s12 = scalar_lea.vmem %s2827_s1, %s2390_s9 }
  0x3a   :  { %v242_v4 = vld [vmem:[%s222_s12] sm:$0x1] }
  0x3b   :  { %243 = vst [vmem:[#allocation2 + $0x1] sm:$0x1] %v242_v4 }
  0x3c   :  { %268 = vsyncadd [#allocation4 + $0x1], 16  ;;  %s2391_s13 = sld [smem:[#allocation6 + $0x81]] }
  0x42   :  { %s271_s16 = scalar_lea.vmem %s2827_s1, %s2391_s13 }
  0x43   :  { %v291_v5 = vld [vmem:[%s271_s16] sm:$0x1] }
  0x44   :  { %292 = vst [vmem:[#allocation2 + $0x9] sm:$0x1] %v291_v5 }
  0x45   :  { %317 = vsyncadd [#allocation4 + $0x9], 16  ;;  %s2392_s17 = sld [smem:[#allocation6 + $0x82]] }
  0x4b   :  { %s320_s20 = scalar_lea.vmem %s2827_s1, %s2392_s17 }
  0x4c   :  { %v340_v6 = vld [vmem:[%s320_s20] sm:$0x1] }
  0x4d   :  { %341 = vst [vmem:[#allocation2 + $0x11] sm:$0x1] %v340_v6 }
  0x4e   :  { %366 = vsyncadd [#allocation4 + $0x11], 16  ;;  %s2393_s21 = sld [smem:[#allocation6 + $0x83]] }
  0x54   :  { %s369_s0 = scalar_lea.vmem %s2827_s1, %s2393_s21 }
  0x55   :  { %v389_v7 = vld [vmem:[%s369_s0] sm:$0x1] }
  0x56   :  { %390 = vst [vmem:[#allocation2 + $0x19] sm:$0x1] %v389_v7 }
  0x57   :  { %415 = vsyncadd [#allocation4 + $0x19], 16  ;;  %s2394_s24 = sld [smem:[#allocation6 + $0x100]] }
  0x5d   :  { %s419_s27 = scalar_lea.vmem %s2827_s1, %s2394_s24 }
  0x5e   :  { %v439_v8 = vld [vmem:[%s419_s27] sm:$0x1] }
  0x5f   :  { %440 = vst [vmem:[#allocation2 + $0x2] sm:$0x1] %v439_v8 }
  0x60   :  { %465 = vsyncadd [#allocation4 + $0x2], 16  ;;  %s2395_s28 = sld [smem:[#allocation6 + $0x101]] }
  0x66   :  { %s468_s5 = scalar_lea.vmem %s2827_s1, %s2395_s28 }
  0x67   :  { %v488_v9 = vld [vmem:[%s468_s5] sm:$0x1] }
  0x68   :  { %489 = vst [vmem:[#allocation2 + $0xa] sm:$0x1] %v488_v9 }
  0x69   :  { %514 = vsyncadd [#allocation4 + $0xa], 16  ;;  %s2396_s6 = sld [smem:[#allocation6 + $0x102]] }
  0x6f   :  { %s517_s9 = scalar_lea.vmem %s2827_s1, %s2396_s6 }
  0x70   :  { %v537_v10 = vld [vmem:[%s517_s9] sm:$0x1] }
  0x71   :  { %538 = vst [vmem:[#allocation2 + $0x12] sm:$0x1] %v537_v10 }
  0x72   :  { %563 = vsyncadd [#allocation4 + $0x12], 16  ;;  %s2397_s10 = sld [smem:[#allocation6 + $0x103]] }
  0x78   :  { %s566_s13 = scalar_lea.vmem %s2827_s1, %s2397_s10 }
  0x79   :  { %v586_v11 = vld [vmem:[%s566_s13] sm:$0x1] }
  0x7a   :  { %587 = vst [vmem:[#allocation2 + $0x1a] sm:$0x1] %v586_v11 }
  0x7b   :  { %612 = vsyncadd [#allocation4 + $0x1a], 16  ;;  %s2398_s14 = sld [smem:[#allocation6 + $0x180]] }
  0x81   :  { %s616_s17 = scalar_lea.vmem %s2827_s1, %s2398_s14 }
  0x82   :  { %v636_v12 = vld [vmem:[%s616_s17] sm:$0x1] }
  0x83   :  { %637 = vst [vmem:[#allocation2 + $0x3] sm:$0x1] %v636_v12 }
  0x84   :  { %662 = vsyncadd [#allocation4 + $0x3], 16  ;;  %s2399_s18 = sld [smem:[#allocation6 + $0x181]] }
  0x8a   :  { %s665_s21 = scalar_lea.vmem %s2827_s1, %s2399_s18 }
  0x8b   :  { %v685_v13 = vld [vmem:[%s665_s21] sm:$0x1] }
  0x8c   :  { %686 = vst [vmem:[#allocation2 + $0xb] sm:$0x1] %v685_v13 }
  0x8d   :  { %711 = vsyncadd [#allocation4 + $0xb], 16  ;;  %s2400_s22 = sld [smem:[#allocation6 + $0x182]] }
  0x93   :  { %s714_s24 = scalar_lea.vmem %s2827_s1, %s2400_s22 }
  0x94   :  { %v734_v14 = vld [vmem:[%s714_s24] sm:$0x1] }
  0x95   :  { %735 = vst [vmem:[#allocation2 + $0x13] sm:$0x1] %v734_v14 }
  0x96   :  { %760 = vsyncadd [#allocation4 + $0x13], 16  ;;  %s2401_s25 = sld [smem:[#allocation6 + $0x183]] }
  0x9c   :  { %s763_s28 = scalar_lea.vmem %s2827_s1, %s2401_s25 }
  0x9d   :  { %v783_v15 = vld [vmem:[%s763_s28] sm:$0x1] }
  0x9e   :  { %784 = vst [vmem:[#allocation2 + $0x1b] sm:$0x1] %v783_v15 }
  0x9f   :  { %809 = vsyncadd [#allocation4 + $0x1b], 16  ;;  %s2402_s29 = sld [smem:[#allocation6 + $0x200]] }
  0xa5   :  { %s813_s6 = scalar_lea.vmem %s2827_s1, %s2402_s29 }
  0xa6   :  { %v833_v16 = vld [vmem:[%s813_s6] sm:$0x1] }
  0xa7   :  { %834 = vst [vmem:[#allocation2 + $0x4] sm:$0x1] %v833_v16 }
  0xa8   :  { %859 = vsyncadd [#allocation4 + $0x4], 16  ;;  %s2403_s7 = sld [smem:[#allocation6 + $0x201]] }
  0xae   :  { %s862_s10 = scalar_lea.vmem %s2827_s1, %s2403_s7 }
  0xaf   :  { %v882_v17 = vld [vmem:[%s862_s10] sm:$0x1] }
  0xb0   :  { %883 = vst [vmem:[#allocation2 + $0xc] sm:$0x1] %v882_v17 }
  0xb1   :  { %908 = vsyncadd [#allocation4 + $0xc], 16  ;;  %s2404_s11 = sld [smem:[#allocation6 + $0x202]] }
  0xb7   :  { %s911_s14 = scalar_lea.vmem %s2827_s1, %s2404_s11 }
  0xb8   :  { %v931_v18 = vld [vmem:[%s911_s14] sm:$0x1] }
  0xb9   :  { %932 = vst [vmem:[#allocation2 + $0x14] sm:$0x1] %v931_v18 }
  0xba   :  { %957 = vsyncadd [#allocation4 + $0x14], 16  ;;  %s2405_s15 = sld [smem:[#allocation6 + $0x203]] }
  0xc0   :  { %s960_s18 = scalar_lea.vmem %s2827_s1, %s2405_s15 }
  0xc1   :  { %v980_v19 = vld [vmem:[%s960_s18] sm:$0x1] }
  0xc2   :  { %981 = vst [vmem:[#allocation2 + $0x1c] sm:$0x1] %v980_v19 }
  0xc3   :  { %1006 = vsyncadd [#allocation4 + $0x1c], 16  ;;  %s2406_s19 = sld [smem:[#allocation6 + $0x280]] }
  0xc9   :  { %s1010_s22 = scalar_lea.vmem %s2827_s1, %s2406_s19 }
  0xca   :  { %v1030_v20 = vld [vmem:[%s1010_s22] sm:$0x1] }
  0xcb   :  { %1031 = vst [vmem:[#allocation2 + $0x5] sm:$0x1] %v1030_v20 }
  0xcc   :  { %1056 = vsyncadd [#allocation4 + $0x5], 16  ;;  %s2407_s23 = sld [smem:[#allocation6 + $0x281]] }
  0xd2   :  { %s1059_s25 = scalar_lea.vmem %s2827_s1, %s2407_s23 }
  0xd3   :  { %v1079_v21 = vld [vmem:[%s1059_s25] sm:$0x1] }
  0xd4   :  { %1080 = vst [vmem:[#allocation2 + $0xd] sm:$0x1] %v1079_v21 }
  0xd5   :  { %1105 = vsyncadd [#allocation4 + $0xd], 16  ;;  %s2408_s26 = sld [smem:[#allocation6 + $0x282]] }
  0xdb   :  { %s1108_s29 = scalar_lea.vmem %s2827_s1, %s2408_s26 }
  0xdc   :  { %v1128_v22 = vld [vmem:[%s1108_s29] sm:$0x1] }
  0xdd   :  { %1129 = vst [vmem:[#allocation2 + $0x15] sm:$0x1] %v1128_v22 }
  0xde   :  { %1154 = vsyncadd [#allocation4 + $0x15], 16  ;;  %s2409_s30 = sld [smem:[#allocation6 + $0x283]] }
  0xe4   :  { %s1157_s7 = scalar_lea.vmem %s2827_s1, %s2409_s30 }
  0xe5   :  { %v1177_v23 = vld [vmem:[%s1157_s7] sm:$0x1] }
  0xe6   :  { %1178 = vst [vmem:[#allocation2 + $0x1d] sm:$0x1] %v1177_v23 }
  0xe7   :  { %1203 = vsyncadd [#allocation4 + $0x1d], 16  ;;  %s2410_s8 = sld [smem:[#allocation6 + $0x300]] }
  0xed   :  { %s1207_s11 = scalar_lea.vmem %s2827_s1, %s2410_s8 }
  0xee   :  { %v1227_v24 = vld [vmem:[%s1207_s11] sm:$0x1] }
  0xef   :  { %1228 = vst [vmem:[#allocation2 + $0x6] sm:$0x1] %v1227_v24 }
  0xf0   :  { %1253 = vsyncadd [#allocation4 + $0x6], 16  ;;  %s2411_s12 = sld [smem:[#allocation6 + $0x301]] }
  0xf6   :  { %s1256_s15 = scalar_lea.vmem %s2827_s1, %s2411_s12 }
  0xf7   :  { %v1276_v25 = vld [vmem:[%s1256_s15] sm:$0x1] }
  0xf8   :  { %1277 = vst [vmem:[#allocation2 + $0xe] sm:$0x1] %v1276_v25 }
  0xf9   :  { %1302 = vsyncadd [#allocation4 + $0xe], 16  ;;  %s2412_s16 = sld [smem:[#allocation6 + $0x302]] }
  0xff   :  { %s1305_s19 = scalar_lea.vmem %s2827_s1, %s2412_s16 }
 0x100   :  { %v1325_v26 = vld [vmem:[%s1305_s19] sm:$0x1] }
 0x101   :  { %1326 = vst [vmem:[#allocation2 + $0x16] sm:$0x1] %v1325_v26 }
 0x102   :  { %1351 = vsyncadd [#allocation4 + $0x16], 16  ;;  %s2413_s20 = sld [smem:[#allocation6 + $0x303]] }
 0x108   :  { %s1354_s23 = scalar_lea.vmem %s2827_s1, %s2413_s20 }
 0x109   :  { %v1374_v27 = vld [vmem:[%s1354_s23] sm:$0x1] }
 0x10a   :  { %1375 = vst [vmem:[#allocation2 + $0x1e] sm:$0x1] %v1374_v27 }
 0x10b   :  { %1400 = vsyncadd [#allocation4 + $0x1e], 16  ;;  %s2414_s0 = sld [smem:[#allocation6 + $0x380]] }
 0x111   :  { %s1404_s26 = scalar_lea.vmem %s2827_s1, %s2414_s0 }
 0x112   :  { %v1424_v28 = vld [vmem:[%s1404_s26] sm:$0x1] }
 0x113   :  { %1425 = vst [vmem:[#allocation2 + $0x7] sm:$0x1] %v1424_v28 }
 0x114   :  { %1450 = vsyncadd [#allocation4 + $0x7], 16  ;;  %s2415_s27 = sld [smem:[#allocation6 + $0x381]] }
 0x11a   :  { %s1453_s30 = scalar_lea.vmem %s2827_s1, %s2415_s27 }
 0x11b   :  { %v1473_v29 = vld [vmem:[%s1453_s30] sm:$0x1] }
 0x11c   :  { %1474 = vst [vmem:[#allocation2 + $0xf] sm:$0x1] %v1473_v29 }
 0x11d   :  { %1499 = vsyncadd [#allocation4 + $0xf], 16  ;;  %s2416_s5 = sld [smem:[#allocation6 + $0x382]] }
 0x123   :  { %s1502_s8 = scalar_lea.vmem %s2827_s1, %s2416_s5 }
 0x124   :  { %v1522_v30 = vld [vmem:[%s1502_s8] sm:$0x1] }
 0x125   :  { %1523 = vst [vmem:[#allocation2 + $0x17] sm:$0x1] %v1522_v30 }
 0x126   :  { %1548 = vsyncadd [#allocation4 + $0x17], 16  ;;  %s2417_s9 = sld [smem:[#allocation6 + $0x383]] }
 0x12c   :  { %s1551_s12 = scalar_lea.vmem %s2827_s1, %s2417_s9 }
 0x12d   :  { %v1571_v31 = vld [vmem:[%s1551_s12] sm:$0x1] }
 0x12e   :  { %1572 = vst [vmem:[#allocation2 + $0x1f] sm:$0x1] %v1571_v31 }
 0x12f   :  { %1597 = vsyncadd [#allocation4 + $0x1f], 16 }
 0x130   :  { %2568 = dma.done.wait [#allocation4], 16 }
 0x131   :  { %2569 = vsyncadd [#allocation4], 4294967280 }
 0x132   :  { %2570 = dma.done.wait [#allocation4 + $0x8], 16 }
 0x133   :  { %2571 = vsyncadd [#allocation4 + $0x8], 4294967280 }
 0x134   :  { %2572 = dma.done.wait [#allocation4 + $0x10], 16 }
 0x135   :  { %2573 = vsyncadd [#allocation4 + $0x10], 4294967280 }
 0x136   :  { %2574 = dma.done.wait [#allocation4 + $0x18], 16 }
 0x137   :  { %2575 = vsyncadd [#allocation4 + $0x18], 4294967280 }
 0x138   :  { %2576 = dma.done.wait [#allocation4 + $0x1], 16 }
 0x139   :  { %2577 = vsyncadd [#allocation4 + $0x1], 4294967280 }
 0x13a   :  { %2578 = dma.done.wait [#allocation4 + $0x9], 16 }
 0x13b   :  { %2579 = vsyncadd [#allocation4 + $0x9], 4294967280 }
 0x13c   :  { %2580 = dma.done.wait [#allocation4 + $0x11], 16 }
 0x13d   :  { %2581 = vsyncadd [#allocation4 + $0x11], 4294967280 }
 0x13e   :  { %2582 = dma.done.wait [#allocation4 + $0x19], 16 }
 0x13f   :  { %2583 = vsyncadd [#allocation4 + $0x19], 4294967280 }
 0x140   :  { %2584 = dma.done.wait [#allocation4 + $0x2], 16 }
 0x141   :  { %2585 = vsyncadd [#allocation4 + $0x2], 4294967280 }
 0x142   :  { %2586 = dma.done.wait [#allocation4 + $0xa], 16 }
 0x143   :  { %2587 = vsyncadd [#allocation4 + $0xa], 4294967280 }
 0x144   :  { %2588 = dma.done.wait [#allocation4 + $0x12], 16 }
 0x145   :  { %2589 = vsyncadd [#allocation4 + $0x12], 4294967280 }
 0x146   :  { %2590 = dma.done.wait [#allocation4 + $0x1a], 16 }
 0x147   :  { %2591 = vsyncadd [#allocation4 + $0x1a], 4294967280 }
 0x148   :  { %2592 = dma.done.wait [#allocation4 + $0x3], 16 }
 0x149   :  { %2593 = vsyncadd [#allocation4 + $0x3], 4294967280 }
 0x14a   :  { %2594 = dma.done.wait [#allocation4 + $0xb], 16 }
 0x14b   :  { %2595 = vsyncadd [#allocation4 + $0xb], 4294967280 }
 0x14c   :  { %2596 = dma.done.wait [#allocation4 + $0x13], 16 }
 0x14d   :  { %2597 = vsyncadd [#allocation4 + $0x13], 4294967280 }
 0x14e   :  { %2598 = dma.done.wait [#allocation4 + $0x1b], 16 }
 0x14f   :  { %2599 = vsyncadd [#allocation4 + $0x1b], 4294967280 }
 0x150   :  { %2600 = dma.done.wait [#allocation4 + $0x4], 16 }
 0x151   :  { %2601 = vsyncadd [#allocation4 + $0x4], 4294967280 }
 0x152   :  { %2602 = dma.done.wait [#allocation4 + $0xc], 16 }
 0x153   :  { %2603 = vsyncadd [#allocation4 + $0xc], 4294967280 }
 0x154   :  { %2604 = dma.done.wait [#allocation4 + $0x14], 16 }
 0x155   :  { %2605 = vsyncadd [#allocation4 + $0x14], 4294967280 }
 0x156   :  { %2606 = dma.done.wait [#allocation4 + $0x1c], 16 }
 0x157   :  { %2607 = vsyncadd [#allocation4 + $0x1c], 4294967280 }
 0x158   :  { %2608 = dma.done.wait [#allocation4 + $0x5], 16 }
 0x159   :  { %2609 = vsyncadd [#allocation4 + $0x5], 4294967280 }
 0x15a   :  { %2610 = dma.done.wait [#allocation4 + $0xd], 16 }
 0x15b   :  { %2611 = vsyncadd [#allocation4 + $0xd], 4294967280 }
 0x15c   :  { %2612 = dma.done.wait [#allocation4 + $0x15], 16 }
 0x15d   :  { %2613 = vsyncadd [#allocation4 + $0x15], 4294967280 }
 0x15e   :  { %2614 = dma.done.wait [#allocation4 + $0x1d], 16 }
 0x15f   :  { %2615 = vsyncadd [#allocation4 + $0x1d], 4294967280 }
 0x160   :  { %2616 = dma.done.wait [#allocation4 + $0x6], 16 }
 0x161   :  { %2617 = vsyncadd [#allocation4 + $0x6], 4294967280 }
 0x162   :  { %2618 = dma.done.wait [#allocation4 + $0xe], 16 }
 0x163   :  { %2619 = vsyncadd [#allocation4 + $0xe], 4294967280 }
 0x164   :  { %2620 = dma.done.wait [#allocation4 + $0x16], 16 }
 0x165   :  { %2621 = vsyncadd [#allocation4 + $0x16], 4294967280 }
 0x166   :  { %2622 = dma.done.wait [#allocation4 + $0x1e], 16 }
 0x167   :  { %2623 = vsyncadd [#allocation4 + $0x1e], 4294967280 }
 0x168   :  { %2624 = dma.done.wait [#allocation4 + $0x7], 16 }
 0x169   :  { %2625 = vsyncadd [#allocation4 + $0x7], 4294967280 }
 0x16a   :  { %2626 = dma.done.wait [#allocation4 + $0xf], 16 }
 0x16b   :  { %2627 = vsyncadd [#allocation4 + $0xf], 4294967280 }
 0x16c   :  { %2628 = dma.done.wait [#allocation4 + $0x17], 16 }
 0x16d   :  { %2629 = vsyncadd [#allocation4 + $0x17], 4294967280 }
 0x16e   :  { %2630 = dma.done.wait [#allocation4 + $0x1f], 16 }
 0x16f   :  { %2631 = vsyncadd [#allocation4 + $0x1f], 4294967280  ;;  %v2635_v32 = vmov 0.0|0.0   ;;  %vm2636_vm0 = vmmov 0   ;;  %v2637_v33 = vmov 0.0   ;;  %v1673_v34 = vld [vmem:[%s2828_s2] sm:$0xff] }
 0x170   :  { %2503 = vmatprep.subr.bf16.mxu0 %v2635_v32  ;;  %2500 = vmatprep.mubr.msk.f32.mxu0 %vm2636_vm0, %v2637_v33  ;;  %v1674_v35 = vld [vmem:[%s2828_s2 + $0x8] sm:$0xff]  ;;  %v1675_v37 = vld [vmem:[%s2828_s2 + $0x10] sm:$0xff]  ;;  %v1676_v38 = vld [vmem:[%s2828_s2 + $0x18] sm:$0xff]  ;;  %s2638_s18 = smov [#allocation7]  }
 0x171   :  { %v2504_v36 = vpack.c.bf16 %v1674_v35, %v1673_v34  ;;  %v2507_v39 = vpack.c.bf16 %v1676_v38, %v1675_v37  ;;  %v1677_v40 = vld [vmem:[%s2828_s2 + $0x20] sm:$0xff]  ;;  %v1678_v41 = vld [vmem:[%s2828_s2 + $0x28] sm:$0xff]  ;;  %v1679_v43 = vld [vmem:[%s2828_s2 + $0x30] sm:$0xff]  ;;  %s1773_s19 = sshll.u32 %s2638_s18, 4  ;;  %s1774_s19 = int_to_ptr.vmem [resolvable:$true] %s1773_s19 }
 0x172   :  { %v2510_v42 = vpack.c.bf16 %v1678_v41, %v1677_v40  ;;  %v1680_v44 = vld [vmem:[%s2828_s2 + $0x38] sm:$0xff]  ;;  %v1681_v46 = vld [vmem:[%s2828_s2 + $0x40] sm:$0xff]  ;;  %v1682_v47 = vld [vmem:[%s2828_s2 + $0x48] sm:$0xff]  ;;  %s2544_s20 = scalar_lea.vmem %s1774_s19, 128  ;;  %p2549_p6 = scmp.lt.s32.totalorder %s1774_s19, %s1774_s19 }
 0x173   :  { %2505 = vmatpush3.bf16.xpose.msra.mxu0 %v2504_v36  ;;  %v2513_v45 = vpack.c.bf16 %v1680_v44, %v1679_v43  ;;  %v2516_v48 = vpack.c.bf16 %v1682_v47, %v1681_v46  ;;  %v1683_v49 = vld [vmem:[%s2828_s2 + $0x50] sm:$0xff]  ;;  %v1684_v50 = vld [vmem:[%s2828_s2 + $0x58] sm:$0xff]  ;;  %v1685_v52 = vld [vmem:[%s2828_s2 + $0x60] sm:$0xff]  ;;  %p2545_p5 = scmp.ne.s32.totalorder %s1774_s19, %s2544_s20  ;;  %p2550_p7 = scmp.lt.s32.totalorder %s2544_s20, %s2544_s20 }
 0x174   :  { %2506 = vmatprep.subr.bf16.mxu0 %v2635_v32  ;;  %v2519_v51 = vpack.c.bf16 %v1684_v50, %v1683_v49  ;;  %v1686_v53 = vld [vmem:[%s2828_s2 + $0x68] sm:$0xff]  ;;  %v1663_v55 = vld [vmem:[#allocation2] sm:$0xff]  ;;  %v1666_v58 = vld [vmem:[#allocation2 + $0x10] sm:$0xff] }
 0x175   :  { %v2522_v54 = vpack.c.bf16 %v1686_v53, %v1685_v52  ;;  %v1664_v56 = vld [vmem:[#allocation2 + $0x8] sm:$0xff]  ;;  %v1687_v59 = vld [vmem:[%s2828_s2 + $0x70] sm:$0xff]  ;;  %v1688_v60 = vld [vmem:[%s2828_s2 + $0x78] sm:$0xff]  ;;  %p2551_p8 = por %p2550_p7, %p2549_p6 }
 0x176   :  { %v1665_v57 = vadd.f32 %v1664_v56, %v1663_v55  ;;  %v2525_v62 = vpack.c.bf16 %v1688_v60, %v1687_v59  ;;  %v1668_v63 = vld [vmem:[#allocation2 + $0x18] sm:$0xff]  ;;  %v2418_v2 = vld [vmem:[%s2829_s3] ss:$0 sm:$0xff] }
 0x177   :  { %p2552_p9 = pnand %p2551_p8, %p2545_p5 }
 0x178   :  { %v1667_v61 = vadd.f32 %v1666_v58, %v1665_v57 }
 0x17a   :  { %v1669_v0 = vadd.f32 %v1668_v63, %v1667_v61 }
 0x17b   :  { %2508 = vmatpush3.bf16.xpose.msra.mxu0 %v2507_v39 }
 0x17c   :  { %2509 = vmatprep.subr.bf16.mxu0 %v2635_v32  ;;  %v1670_v1 = vmul.f32 0.25, %v1669_v0 }
 0x183   :  { %2511 = vmatpush3.bf16.xpose.msra.mxu0 %v2510_v42 }
 0x184   :  { %2512 = vmatprep.subr.bf16.mxu0 %v2635_v32 }
 0x18b   :  { %2514 = vmatpush3.bf16.xpose.msra.mxu0 %v2513_v45 }
 0x18c   :  { %2515 = vmatprep.subr.bf16.mxu0 %v2635_v32 }
 0x193   :  { %2517 = vmatpush3.bf16.xpose.msra.mxu0 %v2516_v48 }
 0x194   :  { %2518 = vmatprep.subr.bf16.mxu0 %v2635_v32 }
 0x19b   :  { %2520 = vmatpush3.bf16.xpose.msra.mxu0 %v2519_v51 }
 0x19c   :  { %2521 = vmatprep.subr.bf16.mxu0 %v2635_v32 }
 0x1a3   :  { %2523 = vmatpush3.bf16.xpose.msra.mxu0 %v2522_v54 }
 0x1a4   :  { %2524 = vmatprep.subr.bf16.mxu0 %v2635_v32 }
 0x1ab   :  { %2526 = vmatpush3.bf16.xpose.msra.mxu0 %v2525_v62 }
 0x1b2   :  { %2501 = vmatmul.mubr.f32.vlgmr.msra.gmra.mrb[0].mxu0 %v1670_v1 }
 0x285   :  { %v1762_v3 = vpop.f32.mrb[0].mxu0 }
 0x286   :  { %v1763_v4 = vadd.f32 %v2418_v2, %v1762_v3  ;;  %v2502_v5 = vpop.f32.mrb[1].mxu0 }
 0x288   :  { %1766 = vst [vmem:[#allocation7] sm:$0xff] %v1763_v4 }
 0x289   :  { %2555 = shalt.err (!%p2552_p9)
}
 0x28a   :  { %s2556_s22 = scalar_lea.hbm %s2830_s4, 128 }
 0x28b   :  { %p2557_p10 = scmp.ne.s32.totalorder %s2830_s4, %s2556_s22  ;;  %p2560_p11 = scmp.lt.u32.totalorder %s2556_s22, %s2830_s4 }
 0x28d   :  { %p2562_p12 = pnand %p2560_p11, %p2557_p10 }
 0x28f   :  { %2565 = shalt.err (!%p2562_p12)
}
 0x290   :  { %1776 = dma.vmem_to_hbm [thread:$0]  %s1774_s19, 128, %s2830_s4, [#allocation8]  }
 0x291   :  { %2632 = dma.done.wait [#allocation8], 128  }
 0x292   :  { %2633 = vsyncadd [#allocation8], 4294967168 }
 0x293   :  { %1780 = vsyncpa [#allocation8], 1 }
 0x294   :  { %1781 = vsyncmov [#allocation4] }
 0x297   :  { %s1782_s27 = vpop.sfrf %1781 }
 0x298   :  { %p2419_p13 = scmp.ne.s32.totalorder %s1782_s27, 0 }
 0x29a   :  { %1786 = shalt.err (%p2419_p13)  }
 0x29b   :  { %1788 = vsyncmov [#allocation4 + $0x1] }
 0x29e   :  { %s1789_s28 = vpop.sfrf %1788 }
 0x29f   :  { %p2420_p0 = scmp.ne.s32.totalorder %s1789_s28, 0 }
 0x2a1   :  { %1793 = shalt.err (%p2420_p0)  }
 0x2a2   :  { %1795 = vsyncmov [#allocation4 + $0x2] }
 0x2a5   :  { %s1796_s29 = vpop.sfrf %1795 }
 0x2a6   :  { %p2421_p1 = scmp.ne.s32.totalorder %s1796_s29, 0 }
 0x2a8   :  { %1800 = shalt.err (%p2421_p1)  }
 0x2a9   :  { %1802 = vsyncmov [#allocation4 + $0x3] }
 0x2ac   :  { %s1803_s30 = vpop.sfrf %1802 }
 0x2ad   :  { %p2422_p2 = scmp.ne.s32.totalorder %s1803_s30, 0 }
 0x2af   :  { %1807 = shalt.err (%p2422_p2)  }
 0x2b0   :  { %1809 = vsyncmov [#allocation4 + $0x4] }
 0x2b3   :  { %s1810_s4 = vpop.sfrf %1809 }
 0x2b4   :  { %p2423_p3 = scmp.ne.s32.totalorder %s1810_s4, 0 }
 0x2b6   :  { %1814 = shalt.err (%p2423_p3)  }
 0x2b7   :  { %1816 = vsyncmov [#allocation4 + $0x5] }
 0x2ba   :  { %s1817_s5 = vpop.sfrf %1816 }
 0x2bb   :  { %p2424_p4 = scmp.ne.s32.totalorder %s1817_s5, 0 }
 0x2bd   :  { %1821 = shalt.err (%p2424_p4)  }
 0x2be   :  { %1823 = vsyncmov [#allocation4 + $0x6] }
 0x2c1   :  { %s1824_s6 = vpop.sfrf %1823 }
 0x2c2   :  { %p2425_p5 = scmp.ne.s32.totalorder %s1824_s6, 0 }
 0x2c4   :  { %1828 = shalt.err (%p2425_p5)  }
 0x2c5   :  { %1830 = vsyncmov [#allocation4 + $0x7] }
 0x2c8   :  { %s1831_s7 = vpop.sfrf %1830 }
 0x2c9   :  { %p2426_p6 = scmp.ne.s32.totalorder %s1831_s7, 0 }
 0x2cb   :  { %1835 = shalt.err (%p2426_p6)  }
 0x2cc   :  { %1837 = vsyncmov [#allocation4 + $0x8] }
 0x2cf   :  { %s1838_s8 = vpop.sfrf %1837 }
 0x2d0   :  { %p2427_p7 = scmp.ne.s32.totalorder %s1838_s8, 0 }
 0x2d2   :  { %1842 = shalt.err (%p2427_p7)  }
 0x2d3   :  { %1844 = vsyncmov [#allocation4 + $0x9] }
 0x2d6   :  { %s1845_s9 = vpop.sfrf %1844 }
 0x2d7   :  { %p2428_p8 = scmp.ne.s32.totalorder %s1845_s9, 0 }
 0x2d9   :  { %1849 = shalt.err (%p2428_p8)  }
 0x2da   :  { %1851 = vsyncmov [#allocation4 + $0xa] }
 0x2dd   :  { %s1852_s10 = vpop.sfrf %1851 }
 0x2de   :  { %p2429_p9 = scmp.ne.s32.totalorder %s1852_s10, 0 }
 0x2e0   :  { %1856 = shalt.err (%p2429_p9)  }
 0x2e1   :  { %1858 = vsyncmov [#allocation4 + $0xb] }
 0x2e4   :  { %s1859_s11 = vpop.sfrf %1858 }
 0x2e5   :  { %p2430_p10 = scmp.ne.s32.totalorder %s1859_s11, 0 }
 0x2e7   :  { %1863 = shalt.err (%p2430_p10)  }
 0x2e8   :  { %1865 = vsyncmov [#allocation4 + $0xc] }
 0x2eb   :  { %s1866_s12 = vpop.sfrf %1865 }
 0x2ec   :  { %p2431_p11 = scmp.ne.s32.totalorder %s1866_s12, 0 }
 0x2ee   :  { %1870 = shalt.err (%p2431_p11)  }
 0x2ef   :  { %1872 = vsyncmov [#allocation4 + $0xd] }
 0x2f2   :  { %s1873_s1 = vpop.sfrf %1872 }
 0x2f3   :  { %p2432_p12 = scmp.ne.s32.totalorder %s1873_s1, 0 }
 0x2f5   :  { %1877 = shalt.err (%p2432_p12)  }
 0x2f6   :  { %1879 = vsyncmov [#allocation4 + $0xe] }
 0x2f9   :  { %s1880_s13 = vpop.sfrf %1879 }
 0x2fa   :  { %p2433_p13 = scmp.ne.s32.totalorder %s1880_s13, 0 }
 0x2fc   :  { %1884 = shalt.err (%p2433_p13)  }
 0x2fd   :  { %1886 = vsyncmov [#allocation4 + $0xf] }
 0x300   :  { %s1887_s14 = vpop.sfrf %1886 }
 0x301   :  { %p2434_p0 = scmp.ne.s32.totalorder %s1887_s14, 0 }
 0x303   :  { %1891 = shalt.err (%p2434_p0)  }
 0x304   :  { %1893 = vsyncmov [#allocation4 + $0x10] }
 0x307   :  { %s1894_s15 = vpop.sfrf %1893 }
 0x308   :  { %p2435_p1 = scmp.ne.s32.totalorder %s1894_s15, 0 }
 0x30a   :  { %1898 = shalt.err (%p2435_p1)  }
 0x30b   :  { %1900 = vsyncmov [#allocation4 + $0x11] }
 0x30e   :  { %s1901_s16 = vpop.sfrf %1900 }
 0x30f   :  { %p2436_p2 = scmp.ne.s32.totalorder %s1901_s16, 0 }
 0x311   :  { %1905 = shalt.err (%p2436_p2)  }
 0x312   :  { %1907 = vsyncmov [#allocation4 + $0x12] }
 0x315   :  { %s1908_s17 = vpop.sfrf %1907 }
 0x316   :  { %p2437_p3 = scmp.ne.s32.totalorder %s1908_s17, 0 }
 0x318   :  { %1912 = shalt.err (%p2437_p3)  }
 0x319   :  { %1914 = vsyncmov [#allocation4 + $0x13] }
 0x31c   :  { %s1915_s18 = vpop.sfrf %1914 }
 0x31d   :  { %p2438_p4 = scmp.ne.s32.totalorder %s1915_s18, 0 }
 0x31f   :  { %1919 = shalt.err (%p2438_p4)  }
 0x320   :  { %1921 = vsyncmov [#allocation4 + $0x14] }
 0x323   :  { %s1922_s19 = vpop.sfrf %1921 }
 0x324   :  { %p2439_p5 = scmp.ne.s32.totalorder %s1922_s19, 0 }
 0x326   :  { %1926 = shalt.err (%p2439_p5)  }
 0x327   :  { %1928 = vsyncmov [#allocation4 + $0x15] }
 0x32a   :  { %s1929_s20 = vpop.sfrf %1928 }
 0x32b   :  { %p2440_p6 = scmp.ne.s32.totalorder %s1929_s20, 0 }
 0x32d   :  { %1933 = shalt.err (%p2440_p6)  }
 0x32e   :  { %1935 = vsyncmov [#allocation4 + $0x16] }
 0x331   :  { %s1936_s2 = vpop.sfrf %1935 }
 0x332   :  { %p2441_p7 = scmp.ne.s32.totalorder %s1936_s2, 0 }
 0x334   :  { %1940 = shalt.err (%p2441_p7)  }
 0x335   :  { %1942 = vsyncmov [#allocation4 + $0x17] }
 0x338   :  { %s1943_s21 = vpop.sfrf %1942 }
 0x339   :  { %p2442_p8 = scmp.ne.s32.totalorder %s1943_s21, 0 }
 0x33b   :  { %1947 = shalt.err (%p2442_p8)  }
 0x33c   :  { %1949 = vsyncmov [#allocation4 + $0x18] }
 0x33f   :  { %s1950_s22 = vpop.sfrf %1949 }
 0x340   :  { %p2443_p9 = scmp.ne.s32.totalorder %s1950_s22, 0 }
 0x342   :  { %1954 = shalt.err (%p2443_p9)  }
 0x343   :  { %1956 = vsyncmov [#allocation4 + $0x19] }
 0x346   :  { %s1957_s23 = vpop.sfrf %1956 }
 0x347   :  { %p2444_p10 = scmp.ne.s32.totalorder %s1957_s23, 0 }
 0x349   :  { %1961 = shalt.err (%p2444_p10)  }
 0x34a   :  { %1963 = vsyncmov [#allocation4 + $0x1a] }
 0x34d   :  { %s1964_s3 = vpop.sfrf %1963 }
 0x34e   :  { %p2445_p11 = scmp.ne.s32.totalorder %s1964_s3, 0 }
 0x350   :  { %1968 = shalt.err (%p2445_p11)  }
 0x351   :  { %1970 = vsyncmov [#allocation4 + $0x1b] }
 0x354   :  { %s1971_s0 = vpop.sfrf %1970 }
 0x355   :  { %p2446_p12 = scmp.ne.s32.totalorder %s1971_s0, 0 }
 0x357   :  { %1975 = shalt.err (%p2446_p12)  }
 0x358   :  { %1977 = vsyncmov [#allocation4 + $0x1c] }
 0x35b   :  { %s1978_s24 = vpop.sfrf %1977 }
 0x35c   :  { %p2447_p13 = scmp.ne.s32.totalorder %s1978_s24, 0 }
 0x35e   :  { %1982 = shalt.err (%p2447_p13)  }
 0x35f   :  { %1984 = vsyncmov [#allocation4 + $0x1d] }
 0x362   :  { %s1985_s25 = vpop.sfrf %1984 }
 0x363   :  { %p2448_p0 = scmp.ne.s32.totalorder %s1985_s25, 0 }
 0x365   :  { %1989 = shalt.err (%p2448_p0)  }
 0x366   :  { %1991 = vsyncmov [#allocation4 + $0x1e] }
 0x369   :  { %s1992_s26 = vpop.sfrf %1991 }
 0x36a   :  { %p2449_p1 = scmp.ne.s32.totalorder %s1992_s26, 0 }
 0x36c   :  { %1996 = shalt.err (%p2449_p1)  }
 0x36d   :  { %1998 = vsyncmov [#allocation4 + $0x1f] }
 0x370   :  { %s1999_s27 = vpop.sfrf %1998 }
 0x371   :  { %p2450_p2 = scmp.ne.s32.totalorder %s1999_s27, 0 }
 0x373   :  { %2003 = shalt.err (%p2450_p2)  }

</bundles_post_ra>
